<compile_context>
chip_gen: v5e
topology: v5e:2x2
jax: 0.10.0
libtpu: 0.0.40
codegen_flags: <defaults>
</compile_context>

<pallas_src>
import functools

import jax
import jax.numpy as jnp
from jax.experimental import pallas as pl
from jax.experimental.pallas import tpu as pltpu

MXU_DTYPE = jnp.bfloat16   # bf16 matmul operands, f32 accumulation everywhere.


# ----------------------------------------------------------------------------
# Fused kernel: ip_in_fc -> LSTM -> ip_fc -> impute -> L1 losses (pos & vel)
# ----------------------------------------------------------------------------
def _midas_fused_kernel(x_ref, tgt_ref, msk_ref,
                        w_in_ref, b_in_ref, w_ih_ref, b_lstm_ref,
                        w_hh_ref, w_out_ref, b_out_ref,
                        out_ref, sums_ref,
                        gx_ref, h_all_ref,
                        *, seq_len, bpad, hidden, mxu_dtype, unroll):
    f32 = jnp.float32
    H = hidden
    H4 = 4 * H

    def mxu(a, w_ref):
        return jnp.dot(a.astype(mxu_dtype), w_ref[...],
                       preferred_element_type=f32)

    # ---- ip_in_fc (Linear + ReLU) on all seq*Bpad rows at once (one MXU matmul).
    z = jnp.maximum(mxu(x_ref[...], w_in_ref) + b_in_ref[...], 0.0)   # (S*Bp, P)

    # ---- LSTM input projection hoisted out of the recurrence; both biases folded
    #      in here.  Stored as (S, Bpad, 4H) so each per-step read is a full tile.
    gx_ref[...] = (mxu(z, w_ih_ref) + b_lstm_ref[...]).reshape(seq_len, bpad, H4)

    # ---- Recurrence.  State is kept 128 lanes wide: the real cell/hidden state
    #      lives in lane block 1 ([ - | c | - | - ]); W_hh / W_out are zero-padded
    #      so only block-1 rows contribute.  PyTorch gate order in lanes: i,f,g,o.
    lane = jax.lax.broadcasted_iota(jnp.int32, (bpad, H4), 1)
    g_blk = (lane >= 2 * H) & (lane < 3 * H)      # lanes of the cell ("g") gate
    c_blk = (lane >= H) & (lane < 2 * H)          # lanes holding the real c/h
    # tanh(x) = 2*sigmoid(2x) - 1: one EUP pass over the full 4H gate vreg instead
    # of evaluating both tanh(gates) and sigmoid(gates).
    act_mul = jnp.where(g_blk, 2.0, 1.0).astype(f32)
    act_off = jnp.where(g_blk, -1.0, 0.0).astype(f32)

    def step(t, carry):
        h_full, c_full = carry
        gates = gx_ref[t] + mxu(h_full, w_hh_ref)            # (Bpad, 4H) f32
        act = jax.nn.sigmoid(gates * act_mul) * act_mul + act_off   # [i|f|g|o]
        # Roll-based cross-block products (XLU, off the VALU/EUP path).  The
        # construction is direction-agnostic for the lanes we keep:
        #   act_r           = [ g | o | i | f ]   (2H roll, symmetric)
        #   ig = act*act_r  = [i*g|f*o|i*g|f*o]   (2H-periodic)
        #   roll(ig, H)     = [f*o|i*g|f*o|i*g]   -> block 1 = i*g either direction
        act_r = pltpu.roll(act, 2 * H, axis=1)
        ig = act * act_r
        c_new = act * c_full + pltpu.roll(ig, H, axis=1)     # block 1: f*c + i*g
        c_full = jnp.where(c_blk, c_new, 0.0)                # keep pad lanes at 0
        h_full = act_r * jnp.tanh(c_full)                    # block 1: o*tanh(c)
        h_all_ref[t] = h_full                                # full (8,128) store
        return (h_full, c_full)

    init = (jnp.zeros((bpad, H4), f32), jnp.zeros((bpad, H4), f32))
    jax.lax.fori_loop(0, seq_len, step, init, unroll=unroll)

    # ---- ip_fc on the whole hidden-state slab (single MXU matmul, 128-lane out).
    hs = h_all_ref[...].reshape(seq_len * bpad, H4)
    pred = mxu(hs, w_out_ref) + b_out_ref[...]               # (S*Bp, 128) f32

    # ---- Fused imputation + L1 losses.  Padded rows/lanes have mask == 1, so
    #      they contribute exactly 0 to both the |err| sums and the counts.
    m = msk_ref[...]
    t_ = tgt_ref[...]
    w = 1.0 - m
    imputed = m * t_ + w * pred
    out_ref[...] = imputed                                   # lane-dense store

    err = jnp.abs((imputed - t_) * w)
    col = jax.lax.broadcasted_iota(jnp.int32, err.shape, 1)
    is_pos = (col & 3) < 2            # per-player cols [x, y, vx, vy]: 0,1 = pos
    pos_err = jnp.sum(jnp.where(is_pos, err, 0.0))
    pos_w = jnp.sum(jnp.where(is_pos, w, 0.0))
    tot_err = jnp.sum(err)
    tot_w = jnp.sum(w)
    sums_ref[0] = pos_err             # pos |err| sum
    sums_ref[1] = pos_w               # pos (1-mask) count
    sums_ref[2] = tot_err - pos_err   # vel |err| sum (by subtraction)
    sums_ref[3] = tot_w - pos_w       # vel (1-mask) count


def midas_fused(x2d, tgt2d, msk2d, Wp, *, seq_len, bpad, hidden):
    """x2d: (seq*Bpad, Din) time-major; tgt2d/msk2d: (seq*Bpad, 128) padded.
    Returns (imputed (seq*Bpad, 128) f32, sums (4,) f32)."""
    SB, Din = x2d.shape
    P = Wp["w_in"].shape[1]
    Dpad = Wp["w_out_pad"].shape[1]
    H4 = 4 * hidden
    kernel = functools.partial(
        _midas_fused_kernel, seq_len=seq_len, bpad=bpad, hidden=hidden,
        mxu_dtype=Wp["w_in"].dtype, unroll=max(1, min(seq_len, 8)))
    # Whole working set is a few hundred KiB at these sizes -> grid=(1,).
    # TODO(synk): production sizes: tile the padded-batch axis ("parallel"),
    # emit per-tile partial sums, and budget VMEM per generation (see header).
    return pl.pallas_call(
        kernel,
        out_shape=(
            jax.ShapeDtypeStruct((SB, Dpad), jnp.float32),
            jax.ShapeDtypeStruct((4,), jnp.float32),
        ),
        grid=(1,),
        in_specs=[
            pl.BlockSpec((SB, Din), lambda i: (0, 0)),
            pl.BlockSpec((SB, Dpad), lambda i: (0, 0)),
            pl.BlockSpec((SB, Dpad), lambda i: (0, 0)),
            pl.BlockSpec((Din, P), lambda i: (0, 0)),
            pl.BlockSpec((1, P), lambda i: (0, 0)),
            pl.BlockSpec((P, H4), lambda i: (0, 0)),
            pl.BlockSpec((1, H4), lambda i: (0, 0)),
            pl.BlockSpec((H4, H4), lambda i: (0, 0)),
            pl.BlockSpec((H4, Dpad), lambda i: (0, 0)),
            pl.BlockSpec((1, Dpad), lambda i: (0, 0)),
        ],
        out_specs=(
            pl.BlockSpec((SB, Dpad), lambda i: (0, 0)),
            pl.BlockSpec(memory_space=pltpu.MemorySpace.SMEM),
        ),
        scratch_shapes=[
            pltpu.VMEM((seq_len, bpad, H4), jnp.float32),   # gates_x slab
            pltpu.VMEM((seq_len, bpad, H4), jnp.float32),   # all-timestep h slab
        ],
        compiler_params=pltpu.CompilerParams(dimension_semantics=("arbitrary",)),
    )(x2d, tgt2d, msk2d, Wp["w_in"], Wp["b_in"], Wp["w_ih"], Wp["b_lstm"],
      Wp["w_hh_pad"], Wp["w_out_pad"], Wp["b_out_pad"])


# ----------------------------------------------------------------------------
# Weight preparation (once at init): bf16 cast + 128-lane zero padding
# ----------------------------------------------------------------------------
def prepare_weights(W, *, hidden, ip_out_dim, mxu_dtype=MXU_DTYPE):
    H = hidden
    d_pad = pl.cdiv(ip_out_dim, 128) * 128
    # W_hh / W_out are placed in rows [H:2H) of zero-padded 4H-row matrices so the
    # 128-lane padded LSTM state can be used directly (block 1 holds the real h).
    # NOTE: at H=32 (4H=128) the padded matmul is a single MXU pass either way; if
    # rnn_dim grows, switch to a compact (B,H) h against an H x 4H W_hh instead.
    w_hh_pad = jnp.zeros((4 * H, 4 * H), jnp.float32).at[H:2 * H, :].set(W["w_hh"])
    w_out_pad = (jnp.zeros((4 * H, d_pad), jnp.float32)
                 .at[H:2 * H, :ip_out_dim].set(W["w_out"]))
    b_out_pad = jnp.zeros((1, d_pad), jnp.float32).at[:, :ip_out_dim].set(W["b_out"])
    return {
        "w_in": W["w_in"].astype(mxu_dtype),
        "b_in": W["b_in"].astype(jnp.float32),
        "w_ih": W["w_ih"].astype(mxu_dtype),
        "b_lstm": W["b_lstm"].astype(jnp.float32),   # bias_ih + bias_hh pre-summed
        "w_hh_pad": w_hh_pad.astype(mxu_dtype),
        "w_out_pad": w_out_pad.astype(mxu_dtype),
        "b_out_pad": b_out_pad,
    }


# ----------------------------------------------------------------------------
# Forward (mirrors MIDASImputer.forward for the plain-LSTM branch)
# ----------------------------------------------------------------------------
def midas_forward(inp, target, mask, Wp, cfg):
    bs, seq_len = inp.shape[:2]
    n_players = cfg["n_players"]
    n_features = cfg["n_features"]
    rnn_dim = cfg["rnn_dim"]
    C = 4 * n_players                              # ip_out_dim
    Bpad = pl.cdiv(bs, 8) * 8                      # pad batch to 8 sublanes
    Dpad = Wp["w_out_pad"].shape[1]                # 128-lane padded output width

    # input.reshape(bs, seq, n_players, -1)[..., :n_features].flatten(2,3).transpose(0,1)
    x = inp.reshape(bs, seq_len, n_players, -1)[..., :n_features]
    x = x.reshape(bs, seq_len, n_players * n_features)
    x = jnp.transpose(x, (1, 0, 2))                              # (S, bs, F) time-major
    x = jnp.pad(x, ((0, 0), (0, Bpad - bs), (0, 0)))             # zero-pad batch rows
    x2d = x.reshape(seq_len * Bpad, n_players * n_features)

    # Target / mask for both modes, time-major, padded to (Bpad, 128).  Mask is
    # padded with ONES so padded rows/lanes contribute nothing to losses/counts.
    tgt4 = target.reshape(bs, seq_len, n_players, n_features)[..., :4]
    msk4 = mask.reshape(bs, seq_len, n_players, n_features)[..., :4]
    tgt_tm = jnp.transpose(tgt4.reshape(bs, seq_len, C), (1, 0, 2))
    msk_tm = jnp.transpose(msk4.reshape(bs, seq_len, C), (1, 0, 2))
    tgt2d = jnp.pad(tgt_tm, ((0, 0), (0, Bpad - bs), (0, Dpad - C))
                    ).reshape(seq_len * Bpad, Dpad)
    msk2d = jnp.pad(msk_tm, ((0, 0), (0, Bpad - bs), (0, Dpad - C)),
                    constant_values=1.0).reshape(seq_len * Bpad, Dpad)

    # ip_in_fc -> ip_rnn -> ip_fc -> imputation -> losses  (ONE fused Pallas kernel)
    imputed_pad, sums = midas_fused(x2d, tgt2d, msk2d, Wp,
                                    seq_len=seq_len, bpad=Bpad, hidden=rnn_dim)

    # NOTE: mirrors the module exactly — no guard against an all-observed mask
    # ((1-mask).sum() == 0 would yield inf/nan, same as the PyTorch code).
    pos_loss = sums[0] / sums[1]
    vel_loss = sums[2] / sums[3]
    total_loss = pos_loss + vel_loss

    imputed = imputed_pad.reshape(seq_len, Bpad, Dpad)[:, :bs, :C]
    imputed = jnp.transpose(imputed, (1, 0, 2))                  # (bs, seq, 4*np)
    imputed4 = imputed.reshape(bs, seq_len, n_players, 4)

    ret = {}
    for mode, (lo, hi), loss in (("pos", (0, 2), pos_loss), ("vel", (2, 4), vel_loss)):
        ret[f"{mode}_pred"] = jnp.transpose(imputed4[..., lo:hi], (0, 2, 1, 3))
        ret[f"{mode}_target"] = jnp.transpose(tgt4[..., lo:hi], (0, 2, 1, 3))
        ret[f"{mode}_mask"] = jnp.transpose(msk4[..., lo:hi], (0, 2, 1, 3))
        ret[f"{mode}_loss"] = loss
    # cat([pos_pred, vel_pred], -1).transpose(1,2).flatten(2,3) == imputed as (bs, seq, 4*np)
    ret["pred"] = imputed4.reshape(bs, seq_len, C)
    ret["total_loss"] = total_loss
    return ret


# ----------------------------------------------------------------------------
# Pure-JAX reference (same bf16-MXU/f32-accumulation arithmetic, torch-style layout ops)
# ----------------------------------------------------------------------------
def reshape_tensor(x, mode, n_players):
    bs, seq, d = x.shape
    k = d // n_players
    x = x.reshape(bs, seq, n_players, k)
    lo, hi = {"pos": (0, 2), "vel": (2, 4), "cartesian_accel": (4, 6)}[mode]
    return x[..., lo:hi]


def _mm(a, b, dt):
    return jnp.dot(a.astype(dt), b.astype(dt), preferred_element_type=jnp.float32)


def forward_ref(inp, target, mask, W, cfg, mxu_dtype=MXU_DTYPE):
    bs, seq_len = inp.shape[:2]
    n_players, n_features, H = cfg["n_players"], cfg["n_features"], cfg["rnn_dim"]
    x = inp.reshape(bs, seq_len, n_players, -1)[..., :n_features]
    x = x.reshape(bs, seq_len, n_players * n_features)
    x = jnp.transpose(x, (1, 0, 2)).reshape(seq_len * bs, -1)
    z = jnp.maximum(_mm(x, W["w_in"], mxu_dtype) + W["b_in"], 0.0)
    gx = (_mm(z, W["w_ih"], mxu_dtype) + W["b_lstm"]).reshape(seq_len, bs, 4 * H)

    def step(carry, g_x):
        h, c = carry
        gates = g_x + _mm(h, W["w_hh"], mxu_dtype)
        i = jax.nn.sigmoid(gates[:, :H])
        f = jax.nn.sigmoid(gates[:, H:2 * H])
        g = jnp.tanh(gates[:, 2 * H:3 * H])
        o = jax.nn.sigmoid(gates[:, 3 * H:])
        c = f * c + i * g
        h = o * jnp.tanh(c)
        return (h, c), h

    init = (jnp.zeros((bs, H), jnp.float32), jnp.zeros((bs, H), jnp.float32))
    _, hs = jax.lax.scan(step, init, gx)
    out = _mm(hs.reshape(seq_len * bs, H), W["w_out"], mxu_dtype) + W["b_out"]
    out = jnp.transpose(out.reshape(seq_len, bs, -1), (1, 0, 2))

    total_loss = 0.0
    preds = []
    for mode in ("pos", "vel"):
        p = jnp.transpose(reshape_tensor(out, mode, n_players), (0, 2, 1, 3))
        t = jnp.transpose(reshape_tensor(target, mode, n_players), (0, 2, 1, 3))
        m = jnp.transpose(reshape_tensor(mask, mode, n_players), (0, 2, 1, 3))
        p = m * t + (1 - m) * p
        total_loss = total_loss + jnp.abs((p - t) * (1 - m)).sum() / (1 - m).sum()
        preds.append(p)
    pred = jnp.transpose(jnp.concatenate(preds, -1), (0, 2, 1, 3)).reshape(bs, seq_len, -1)
    return pred, total_loss


# ----------------------------------------------------------------------------
# Main
# ----------------------------------------------------------------------------
if __name__ == "__main__":
    cfg = dict(
        n_features=6,      # per-player: [x, y, vx, vy, ax, ay]
        team_size=3,
        n_players=3,       # single_team=True
        pi_z_dim=32,
        rnn_dim=32,
    )
    bs, seq_len = 2, 8
    n_players, n_features = cfg["n_players"], cfg["n_features"]
    in_dim = n_players * n_features               # 18
    pi_z_dim, rnn_dim = cfg["pi_z_dim"], cfg["rnn_dim"]
    ip_out_dim = 4 * n_players                    # pos_xy + vel_xy per player

    key = jax.random.PRNGKey(0)
    ks = jax.random.split(key, 12)

    def uni(k, shape, scale):
        return jax.random.uniform(k, shape, jnp.float32, -scale, scale)

    s_in = 1.0 / jnp.sqrt(in_dim)
    s_h = 1.0 / jnp.sqrt(rnn_dim)
    W = {
        "w_in": uni(ks[0], (in_dim, pi_z_dim), s_in),
        "b_in": uni(ks[1], (1, pi_z_dim), s_in),
        "w_ih": uni(ks[2], (pi_z_dim, 4 * rnn_dim), s_h),
        "w_hh": uni(ks[3], (rnn_dim, 4 * rnn_dim), s_h),
        "b_lstm": uni(ks[4], (1, 4 * rnn_dim), s_h),   # bias_ih + bias_hh combined
        "w_out": uni(ks[5], (rnn_dim, ip_out_dim), s_h),
        "b_out": uni(ks[6], (1, ip_out_dim), s_h),
    }
    Wp = prepare_weights(W, hidden=rnn_dim, ip_out_dim=ip_out_dim)

    inp = jax.random.normal(ks[7], (bs, seq_len, n_players * n_features), jnp.float32)
    target = jax.random.normal(ks[8], (bs, seq_len, n_players * n_features), jnp.float32)
    mask = jax.random.bernoulli(ks[9], 0.5, (bs, seq_len, n_players * n_features))
    mask = mask.astype(jnp.float32)

    ret = midas_forward(inp, target, mask, Wp, cfg)
    jax.block_until_ready(ret["pred"])
    jax.block_until_ready(ret["total_loss"])

    pred_ref, loss_ref = forward_ref(inp, target, mask, W, cfg)
    import numpy as np
    np.testing.assert_allclose(np.asarray(ret["pred"]), np.asarray(pred_ref),
                               rtol=1e-2, atol=1e-2)
    np.testing.assert_allclose(float(ret["total_loss"]), float(loss_ref),
                               rtol=1e-2, atol=1e-2)

    print("KERNEL_OK")
</pallas_src>

<mosaic_0001>
module attributes {stable_mosaic.version = 11 : i64} {
  func.func @_midas_fused_kernel(%arg0: i32, %arg1: memref<64x18xf32, #tpu.memory_space<vmem>>, %arg2: memref<64x128xf32, #tpu.memory_space<vmem>>, %arg3: memref<64x128xf32, #tpu.memory_space<vmem>>, %arg4: memref<18x32xbf16, #tpu.memory_space<vmem>>, %arg5: memref<1x32xf32, #tpu.memory_space<vmem>>, %arg6: memref<32x128xbf16, #tpu.memory_space<vmem>>, %arg7: memref<1x128xf32, #tpu.memory_space<vmem>>, %arg8: memref<128x128xbf16, #tpu.memory_space<vmem>>, %arg9: memref<128x128xbf16, #tpu.memory_space<vmem>>, %arg10: memref<1x128xf32, #tpu.memory_space<vmem>>, %arg11: memref<64x128xf32, #tpu.memory_space<vmem>>, %arg12: memref<4xf32, #tpu.memory_space<smem>>, %arg13: memref<8x8x128xf32, #tpu.memory_space<vmem>>, %arg14: memref<8x8x128xf32, #tpu.memory_space<vmem>>) attributes {dimension_semantics = [#tpu.dimension_semantics<arbitrary>], iteration_bounds = array<i64: 1>, scalar_prefetch = 0 : i64, scratch_operands = 2 : i64, tpu.core_type = #tpu.core_type<tc>, window_params = [{pipeline_mode = #tpu.pipeline_mode<synchronous>, transform_indices = @transform_0, window_bounds = array<i64: 64, 18>}, {pipeline_mode = #tpu.pipeline_mode<synchronous>, transform_indices = @transform_1, window_bounds = array<i64: 64, 128>}, {pipeline_mode = #tpu.pipeline_mode<synchronous>, transform_indices = @transform_2, window_bounds = array<i64: 64, 128>}, {pipeline_mode = #tpu.pipeline_mode<synchronous>, transform_indices = @transform_3, window_bounds = array<i64: 18, 32>}, {pipeline_mode = #tpu.pipeline_mode<synchronous>, transform_indices = @transform_4, window_bounds = array<i64: 1, 32>}, {pipeline_mode = #tpu.pipeline_mode<synchronous>, transform_indices = @transform_5, window_bounds = array<i64: 32, 128>}, {pipeline_mode = #tpu.pipeline_mode<synchronous>, transform_indices = @transform_6, window_bounds = array<i64: 1, 128>}, {pipeline_mode = #tpu.pipeline_mode<synchronous>, transform_indices = @transform_7, window_bounds = array<i64: 128, 128>}, {pipeline_mode = #tpu.pipeline_mode<synchronous>, transform_indices = @transform_8, window_bounds = array<i64: 128, 128>}, {pipeline_mode = #tpu.pipeline_mode<synchronous>, transform_indices = @transform_9, window_bounds = array<i64: 1, 128>}, {pipeline_mode = #tpu.pipeline_mode<synchronous>, transform_indices = @transform_10, window_bounds = array<i64: 64, 128>}, {transform_indices = @transform_11, window_bounds = array<i64: 4>}]} {
    %c0 = arith.constant 0 : index
    %c0_0 = arith.constant 0 : index
    %0 = vector.load %arg1[%c0, %c0_0] : memref<64x18xf32, #tpu.memory_space<vmem>>, vector<64x18xf32>
    %1 = arith.truncf %0 : vector<64x18xf32> to vector<64x18xbf16>
    %c0_1 = arith.constant 0 : index
    %c0_2 = arith.constant 0 : index
    %2 = vector.load %arg4[%c0_1, %c0_2] : memref<18x32xbf16, #tpu.memory_space<vmem>>, vector<18x32xbf16>
    %cst = arith.constant dense<0.000000e+00> : vector<64x32xf32>
    %3 = tpu.matmul %1, %2, %cst {dimension_numbers = #tpu.dot_dimension_numbers<[1], [0], [0], [1], [0, 0, 1, 1], [], []>} : vector<64x18xbf16>, vector<18x32xbf16>, vector<64x32xf32> -> vector<64x32xf32>
    %c0_3 = arith.constant 0 : index
    %c0_4 = arith.constant 0 : index
    %4 = vector.load %arg5[%c0_3, %c0_4] : memref<1x32xf32, #tpu.memory_space<vmem>>, vector<1x32xf32>
    %5 = vector.broadcast %4 : vector<1x32xf32> to vector<64x32xf32>
    %6 = arith.addf %3, %5 : vector<64x32xf32>
    %cst_5 = arith.constant 0.000000e+00 : f32
    %7 = vector.broadcast %cst_5 : f32 to vector<64x32xf32>
    %8 = arith.maximumf %6, %7 : vector<64x32xf32>
    %9 = arith.truncf %8 : vector<64x32xf32> to vector<64x32xbf16>
    %c0_6 = arith.constant 0 : index
    %c0_7 = arith.constant 0 : index
    %10 = vector.load %arg6[%c0_6, %c0_7] : memref<32x128xbf16, #tpu.memory_space<vmem>>, vector<32x128xbf16>
    %cst_8 = arith.constant dense<0.000000e+00> : vector<64x128xf32>
    %11 = tpu.matmul %9, %10, %cst_8 {dimension_numbers = #tpu.dot_dimension_numbers<[1], [0], [0], [1], [0, 0, 1, 1], [], []>} : vector<64x32xbf16>, vector<32x128xbf16>, vector<64x128xf32> -> vector<64x128xf32>
    %c0_9 = arith.constant 0 : index
    %c0_10 = arith.constant 0 : index
    %12 = vector.load %arg7[%c0_9, %c0_10] : memref<1x128xf32, #tpu.memory_space<vmem>>, vector<1x128xf32>
    %13 = vector.broadcast %12 : vector<1x128xf32> to vector<64x128xf32>
    %14 = arith.addf %11, %13 : vector<64x128xf32>
    %15 = vector.shape_cast %14 : vector<64x128xf32> to vector<8x8x128xf32>
    %c0_11 = arith.constant 0 : index
    %c0_12 = arith.constant 0 : index
    %c0_13 = arith.constant 0 : index
    %16 = vector.load %arg13[%c0_11, %c0_12, %c0_13] : memref<8x8x128xf32, #tpu.memory_space<vmem>>, vector<8x8x128xf32>
    tpu.vector_store %arg13[%c0_11, %c0_12, %c0_13], %15 {strides = array<i32>} : memref<8x8x128xf32, #tpu.memory_space<vmem>>, vector<8x8x128xf32>,
    %17 = tpu.iota {dimensions = array<i32: 1>} : vector<8x128xi32>
    %c64_i32 = arith.constant 64 : i32
    %18 = vector.broadcast %c64_i32 : i32 to vector<8x128xi32>
    %19 = arith.cmpi sge, %17, %18 : vector<8x128xi32>
    %c96_i32 = arith.constant 96 : i32
    %20 = vector.broadcast %c96_i32 : i32 to vector<8x128xi32>
    %21 = arith.cmpi slt, %17, %20 : vector<8x128xi32>
    %22 = arith.andi %19, %21 : vector<8x128xi1>
    %c32_i32 = arith.constant 32 : i32
    %23 = vector.broadcast %c32_i32 : i32 to vector<8x128xi32>
    %24 = arith.cmpi sge, %17, %23 : vector<8x128xi32>
    %c64_i32_14 = arith.constant 64 : i32
    %25 = vector.broadcast %c64_i32_14 : i32 to vector<8x128xi32>
    %26 = arith.cmpi slt, %17, %25 : vector<8x128xi32>
    %27 = arith.andi %24, %26 : vector<8x128xi1>
    %cst_15 = arith.constant 2.000000e+00 : f32
    %cst_16 = arith.constant 1.000000e+00 : f32
    %28 = vector.broadcast %cst_15 : f32 to vector<8x128xf32>
    %29 = vector.broadcast %cst_16 : f32 to vector<8x128xf32>
    %30 = arith.select %22, %28, %29 : vector<8x128xi1>, vector<8x128xf32>
    %cst_17 = arith.constant -1.000000e+00 : f32
    %cst_18 = arith.constant 0.000000e+00 : f32
    %31 = vector.broadcast %cst_17 : f32 to vector<8x128xf32>
    %32 = vector.broadcast %cst_18 : f32 to vector<8x128xf32>
    %33 = arith.select %22, %31, %32 : vector<8x128xi1>, vector<8x128xf32>
    %cst_19 = arith.constant 0.000000e+00 : f32
    %34 = vector.broadcast %cst_19 : f32 to vector<8x128xf32>
    %cst_20 = arith.constant 0.000000e+00 : f32
    %35 = vector.broadcast %cst_20 : f32 to vector<8x128xf32>
    %c0_i32 = arith.constant 0 : i32
    %36 = arith.index_cast %c0_i32 : i32 to index
    %c0_21 = arith.constant 0 : index
    %c0_22 = arith.constant 0 : index
    %37 = vector.load %arg13[%36, %c0_21, %c0_22] : memref<8x8x128xf32, #tpu.memory_space<vmem>>, vector<1x8x128xf32>
    %38 = vector.shape_cast %37 : vector<1x8x128xf32> to vector<8x128xf32>
    %39 = arith.truncf %34 : vector<8x128xf32> to vector<8x128xbf16>
    %c0_23 = arith.constant 0 : index
    %c0_24 = arith.constant 0 : index
    %40 = vector.load %arg8[%c0_23, %c0_24] : memref<128x128xbf16, #tpu.memory_space<vmem>>, vector<128x128xbf16>
    %cst_25 = arith.constant dense<0.000000e+00> : vector<8x128xf32>
    %41 = tpu.matmul %39, %40, %cst_25 {dimension_numbers = #tpu.dot_dimension_numbers<[1], [0], [0], [1], [0, 0, 1, 1], [], []>} : vector<8x128xbf16>, vector<128x128xbf16>, vector<8x128xf32> -> vector<8x128xf32>
    %42 = arith.addf %38, %41 : vector<8x128xf32>
    %43 = arith.mulf %42, %30 : vector<8x128xf32>
    %44 = arith.negf %43 : vector<8x128xf32>
    %45 = math.exp %44 : vector<8x128xf32>
    %cst_26 = arith.constant 1.000000e+00 : f32
    %46 = vector.broadcast %cst_26 : f32 to vector<8x128xf32>
    %47 = arith.addf %46, %45 : vector<8x128xf32>
    %48 = arith.divf %46, %47 : vector<8x128xf32>
    %49 = arith.mulf %48, %30 : vector<8x128xf32>
    %50 = arith.addf %49, %33 : vector<8x128xf32>
    %c64_i32_27 = arith.constant 64 : i32
    %51 = tpu.dynamic_rotate %50 by %c64_i32_27 dim 1 : vector<8x128xf32>, i32 -> vector<8x128xf32>
    %52 = arith.mulf %50, %51 : vector<8x128xf32>
    %53 = arith.mulf %50, %35 : vector<8x128xf32>
    %c32_i32_28 = arith.constant 32 : i32
    %54 = tpu.dynamic_rotate %52 by %c32_i32_28 dim 1 : vector<8x128xf32>, i32 -> vector<8x128xf32>
    %55 = arith.addf %53, %54 : vector<8x128xf32>
    %cst_29 = arith.constant 0.000000e+00 : f32
    %56 = vector.broadcast %cst_29 : f32 to vector<8x128xf32>
    %57 = arith.select %27, %55, %56 : vector<8x128xi1>, vector<8x128xf32>
    %58 = math.tanh %57 : vector<8x128xf32>
    %59 = arith.mulf %51, %58 : vector<8x128xf32>
    %60 = arith.index_cast %c0_i32 : i32 to index
    %c0_30 = arith.constant 0 : index
    %c0_31 = arith.constant 0 : index
    %61 = vector.load %arg14[%60, %c0_30, %c0_31] : memref<8x8x128xf32, #tpu.memory_space<vmem>>, vector<1x8x128xf32>
    %62 = vector.shape_cast %61 : vector<1x8x128xf32> to vector<8x128xf32>
    %63 = vector.shape_cast %59 : vector<8x128xf32> to vector<1x8x128xf32>
    tpu.vector_store %arg14[%60, %c0_30, %c0_31], %63 {strides = array<i32>} : memref<8x8x128xf32, #tpu.memory_space<vmem>>, vector<1x8x128xf32>,
    %c1_i32 = arith.constant 1 : i32
    %64 = arith.index_cast %c1_i32 : i32 to index
    %c0_32 = arith.constant 0 : index
    %c0_33 = arith.constant 0 : index
    %65 = vector.load %arg13[%64, %c0_32, %c0_33] : memref<8x8x128xf32, #tpu.memory_space<vmem>>, vector<1x8x128xf32>
    %66 = vector.shape_cast %65 : vector<1x8x128xf32> to vector<8x128xf32>
    %67 = arith.truncf %59 : vector<8x128xf32> to vector<8x128xbf16>
    %c0_34 = arith.constant 0 : index
    %c0_35 = arith.constant 0 : index
    %68 = vector.load %arg8[%c0_34, %c0_35] : memref<128x128xbf16, #tpu.memory_space<vmem>>, vector<128x128xbf16>
    %cst_36 = arith.constant dense<0.000000e+00> : vector<8x128xf32>
    %69 = tpu.matmul %67, %68, %cst_36 {dimension_numbers = #tpu.dot_dimension_numbers<[1], [0], [0], [1], [0, 0, 1, 1], [], []>} : vector<8x128xbf16>, vector<128x128xbf16>, vector<8x128xf32> -> vector<8x128xf32>
    %70 = arith.addf %66, %69 : vector<8x128xf32>
    %71 = arith.mulf %70, %30 : vector<8x128xf32>
    %72 = arith.negf %71 : vector<8x128xf32>
    %73 = math.exp %72 : vector<8x128xf32>
    %cst_37 = arith.constant 1.000000e+00 : f32
    %74 = vector.broadcast %cst_37 : f32 to vector<8x128xf32>
    %75 = arith.addf %74, %73 : vector<8x128xf32>
    %76 = arith.divf %74, %75 : vector<8x128xf32>
    %77 = arith.mulf %76, %30 : vector<8x128xf32>
    %78 = arith.addf %77, %33 : vector<8x128xf32>
    %c64_i32_38 = arith.constant 64 : i32
    %79 = tpu.dynamic_rotate %78 by %c64_i32_38 dim 1 : vector<8x128xf32>, i32 -> vector<8x128xf32>
    %80 = arith.mulf %78, %79 : vector<8x128xf32>
    %81 = arith.mulf %78, %57 : vector<8x128xf32>
    %c32_i32_39 = arith.constant 32 : i32
    %82 = tpu.dynamic_rotate %80 by %c32_i32_39 dim 1 : vector<8x128xf32>, i32 -> vector<8x128xf32>
    %83 = arith.addf %81, %82 : vector<8x128xf32>
    %cst_40 = arith.constant 0.000000e+00 : f32
    %84 = vector.broadcast %cst_40 : f32 to vector<8x128xf32>
    %85 = arith.select %27, %83, %84 : vector<8x128xi1>, vector<8x128xf32>
    %86 = math.tanh %85 : vector<8x128xf32>
    %87 = arith.mulf %79, %86 : vector<8x128xf32>
    %88 = arith.index_cast %c1_i32 : i32 to index
    %c0_41 = arith.constant 0 : index
    %c0_42 = arith.constant 0 : index
    %89 = vector.load %arg14[%88, %c0_41, %c0_42] : memref<8x8x128xf32, #tpu.memory_space<vmem>>, vector<1x8x128xf32>
    %90 = vector.shape_cast %89 : vector<1x8x128xf32> to vector<8x128xf32>
    %91 = vector.shape_cast %87 : vector<8x128xf32> to vector<1x8x128xf32>
    tpu.vector_store %arg14[%88, %c0_41, %c0_42], %91 {strides = array<i32>} : memref<8x8x128xf32, #tpu.memory_space<vmem>>, vector<1x8x128xf32>,
    %c2_i32 = arith.constant 2 : i32
    %92 = arith.index_cast %c2_i32 : i32 to index
    %c0_43 = arith.constant 0 : index
    %c0_44 = arith.constant 0 : index
    %93 = vector.load %arg13[%92, %c0_43, %c0_44] : memref<8x8x128xf32, #tpu.memory_space<vmem>>, vector<1x8x128xf32>
    %94 = vector.shape_cast %93 : vector<1x8x128xf32> to vector<8x128xf32>
    %95 = arith.truncf %87 : vector<8x128xf32> to vector<8x128xbf16>
    %c0_45 = arith.constant 0 : index
    %c0_46 = arith.constant 0 : index
    %96 = vector.load %arg8[%c0_45, %c0_46] : memref<128x128xbf16, #tpu.memory_space<vmem>>, vector<128x128xbf16>
    %cst_47 = arith.constant dense<0.000000e+00> : vector<8x128xf32>
    %97 = tpu.matmul %95, %96, %cst_47 {dimension_numbers = #tpu.dot_dimension_numbers<[1], [0], [0], [1], [0, 0, 1, 1], [], []>} : vector<8x128xbf16>, vector<128x128xbf16>, vector<8x128xf32> -> vector<8x128xf32>
    %98 = arith.addf %94, %97 : vector<8x128xf32>
    %99 = arith.mulf %98, %30 : vector<8x128xf32>
    %100 = arith.negf %99 : vector<8x128xf32>
    %101 = math.exp %100 : vector<8x128xf32>
    %cst_48 = arith.constant 1.000000e+00 : f32
    %102 = vector.broadcast %cst_48 : f32 to vector<8x128xf32>
    %103 = arith.addf %102, %101 : vector<8x128xf32>
    %104 = arith.divf %102, %103 : vector<8x128xf32>
    %105 = arith.mulf %104, %30 : vector<8x128xf32>
    %106 = arith.addf %105, %33 : vector<8x128xf32>
    %c64_i32_49 = arith.constant 64 : i32
    %107 = tpu.dynamic_rotate %106 by %c64_i32_49 dim 1 : vector<8x128xf32>, i32 -> vector<8x128xf32>
    %108 = arith.mulf %106, %107 : vector<8x128xf32>
    %109 = arith.mulf %106, %85 : vector<8x128xf32>
    %c32_i32_50 = arith.constant 32 : i32
    %110 = tpu.dynamic_rotate %108 by %c32_i32_50 dim 1 : vector<8x128xf32>, i32 -> vector<8x128xf32>
    %111 = arith.addf %109, %110 : vector<8x128xf32>
    %cst_51 = arith.constant 0.000000e+00 : f32
    %112 = vector.broadcast %cst_51 : f32 to vector<8x128xf32>
    %113 = arith.select %27, %111, %112 : vector<8x128xi1>, vector<8x128xf32>
    %114 = math.tanh %113 : vector<8x128xf32>
    %115 = arith.mulf %107, %114 : vector<8x128xf32>
    %116 = arith.index_cast %c2_i32 : i32 to index
    %c0_52 = arith.constant 0 : index
    %c0_53 = arith.constant 0 : index
    %117 = vector.load %arg14[%116, %c0_52, %c0_53] : memref<8x8x128xf32, #tpu.memory_space<vmem>>, vector<1x8x128xf32>
    %118 = vector.shape_cast %117 : vector<1x8x128xf32> to vector<8x128xf32>
    %119 = vector.shape_cast %115 : vector<8x128xf32> to vector<1x8x128xf32>
    tpu.vector_store %arg14[%116, %c0_52, %c0_53], %119 {strides = array<i32>} : memref<8x8x128xf32, #tpu.memory_space<vmem>>, vector<1x8x128xf32>,
    %c3_i32 = arith.constant 3 : i32
    %120 = arith.index_cast %c3_i32 : i32 to index
    %c0_54 = arith.constant 0 : index
    %c0_55 = arith.constant 0 : index
    %121 = vector.load %arg13[%120, %c0_54, %c0_55] : memref<8x8x128xf32, #tpu.memory_space<vmem>>, vector<1x8x128xf32>
    %122 = vector.shape_cast %121 : vector<1x8x128xf32> to vector<8x128xf32>
    %123 = arith.truncf %115 : vector<8x128xf32> to vector<8x128xbf16>
    %c0_56 = arith.constant 0 : index
    %c0_57 = arith.constant 0 : index
    %124 = vector.load %arg8[%c0_56, %c0_57] : memref<128x128xbf16, #tpu.memory_space<vmem>>, vector<128x128xbf16>
    %cst_58 = arith.constant dense<0.000000e+00> : vector<8x128xf32>
    %125 = tpu.matmul %123, %124, %cst_58 {dimension_numbers = #tpu.dot_dimension_numbers<[1], [0], [0], [1], [0, 0, 1, 1], [], []>} : vector<8x128xbf16>, vector<128x128xbf16>, vector<8x128xf32> -> vector<8x128xf32>
    %126 = arith.addf %122, %125 : vector<8x128xf32>
    %127 = arith.mulf %126, %30 : vector<8x128xf32>
    %128 = arith.negf %127 : vector<8x128xf32>
    %129 = math.exp %128 : vector<8x128xf32>
    %cst_59 = arith.constant 1.000000e+00 : f32
    %130 = vector.broadcast %cst_59 : f32 to vector<8x128xf32>
    %131 = arith.addf %130, %129 : vector<8x128xf32>
    %132 = arith.divf %130, %131 : vector<8x128xf32>
    %133 = arith.mulf %132, %30 : vector<8x128xf32>
    %134 = arith.addf %133, %33 : vector<8x128xf32>
    %c64_i32_60 = arith.constant 64 : i32
    %135 = tpu.dynamic_rotate %134 by %c64_i32_60 dim 1 : vector<8x128xf32>, i32 -> vector<8x128xf32>
    %136 = arith.mulf %134, %135 : vector<8x128xf32>
    %137 = arith.mulf %134, %113 : vector<8x128xf32>
    %c32_i32_61 = arith.constant 32 : i32
    %138 = tpu.dynamic_rotate %136 by %c32_i32_61 dim 1 : vector<8x128xf32>, i32 -> vector<8x128xf32>
    %139 = arith.addf %137, %138 : vector<8x128xf32>
    %cst_62 = arith.constant 0.000000e+00 : f32
    %140 = vector.broadcast %cst_62 : f32 to vector<8x128xf32>
    %141 = arith.select %27, %139, %140 : vector<8x128xi1>, vector<8x128xf32>
    %142 = math.tanh %141 : vector<8x128xf32>
    %143 = arith.mulf %135, %142 : vector<8x128xf32>
    %144 = arith.index_cast %c3_i32 : i32 to index
    %c0_63 = arith.constant 0 : index
    %c0_64 = arith.constant 0 : index
    %145 = vector.load %arg14[%144, %c0_63, %c0_64] : memref<8x8x128xf32, #tpu.memory_space<vmem>>, vector<1x8x128xf32>
    %146 = vector.shape_cast %145 : vector<1x8x128xf32> to vector<8x128xf32>
    %147 = vector.shape_cast %143 : vector<8x128xf32> to vector<1x8x128xf32>
    tpu.vector_store %arg14[%144, %c0_63, %c0_64], %147 {strides = array<i32>} : memref<8x8x128xf32, #tpu.memory_space<vmem>>, vector<1x8x128xf32>,
    %c4_i32 = arith.constant 4 : i32
    %148 = arith.index_cast %c4_i32 : i32 to index
    %c0_65 = arith.constant 0 : index
    %c0_66 = arith.constant 0 : index
    %149 = vector.load %arg13[%148, %c0_65, %c0_66] : memref<8x8x128xf32, #tpu.memory_space<vmem>>, vector<1x8x128xf32>
    %150 = vector.shape_cast %149 : vector<1x8x128xf32> to vector<8x128xf32>
    %151 = arith.truncf %143 : vector<8x128xf32> to vector<8x128xbf16>
    %c0_67 = arith.constant 0 : index
    %c0_68 = arith.constant 0 : index
    %152 = vector.load %arg8[%c0_67, %c0_68] : memref<128x128xbf16, #tpu.memory_space<vmem>>, vector<128x128xbf16>
    %cst_69 = arith.constant dense<0.000000e+00> : vector<8x128xf32>
    %153 = tpu.matmul %151, %152, %cst_69 {dimension_numbers = #tpu.dot_dimension_numbers<[1], [0], [0], [1], [0, 0, 1, 1], [], []>} : vector<8x128xbf16>, vector<128x128xbf16>, vector<8x128xf32> -> vector<8x128xf32>
    %154 = arith.addf %150, %153 : vector<8x128xf32>
    %155 = arith.mulf %154, %30 : vector<8x128xf32>
    %156 = arith.negf %155 : vector<8x128xf32>
    %157 = math.exp %156 : vector<8x128xf32>
    %cst_70 = arith.constant 1.000000e+00 : f32
    %158 = vector.broadcast %cst_70 : f32 to vector<8x128xf32>
    %159 = arith.addf %158, %157 : vector<8x128xf32>
    %160 = arith.divf %158, %159 : vector<8x128xf32>
    %161 = arith.mulf %160, %30 : vector<8x128xf32>
    %162 = arith.addf %161, %33 : vector<8x128xf32>
    %c64_i32_71 = arith.constant 64 : i32
    %163 = tpu.dynamic_rotate %162 by %c64_i32_71 dim 1 : vector<8x128xf32>, i32 -> vector<8x128xf32>
    %164 = arith.mulf %162, %163 : vector<8x128xf32>
    %165 = arith.mulf %162, %141 : vector<8x128xf32>
    %c32_i32_72 = arith.constant 32 : i32
    %166 = tpu.dynamic_rotate %164 by %c32_i32_72 dim 1 : vector<8x128xf32>, i32 -> vector<8x128xf32>
    %167 = arith.addf %165, %166 : vector<8x128xf32>
    %cst_73 = arith.constant 0.000000e+00 : f32
    %168 = vector.broadcast %cst_73 : f32 to vector<8x128xf32>
    %169 = arith.select %27, %167, %168 : vector<8x128xi1>, vector<8x128xf32>
    %170 = math.tanh %169 : vector<8x128xf32>
    %171 = arith.mulf %163, %170 : vector<8x128xf32>
    %172 = arith.index_cast %c4_i32 : i32 to index
    %c0_74 = arith.constant 0 : index
    %c0_75 = arith.constant 0 : index
    %173 = vector.load %arg14[%172, %c0_74, %c0_75] : memref<8x8x128xf32, #tpu.memory_space<vmem>>, vector<1x8x128xf32>
    %174 = vector.shape_cast %173 : vector<1x8x128xf32> to vector<8x128xf32>
    %175 = vector.shape_cast %171 : vector<8x128xf32> to vector<1x8x128xf32>
    tpu.vector_store %arg14[%172, %c0_74, %c0_75], %175 {strides = array<i32>} : memref<8x8x128xf32, #tpu.memory_space<vmem>>, vector<1x8x128xf32>,
    %c5_i32 = arith.constant 5 : i32
    %176 = arith.index_cast %c5_i32 : i32 to index
    %c0_76 = arith.constant 0 : index
    %c0_77 = arith.constant 0 : index
    %177 = vector.load %arg13[%176, %c0_76, %c0_77] : memref<8x8x128xf32, #tpu.memory_space<vmem>>, vector<1x8x128xf32>
    %178 = vector.shape_cast %177 : vector<1x8x128xf32> to vector<8x128xf32>
    %179 = arith.truncf %171 : vector<8x128xf32> to vector<8x128xbf16>
    %c0_78 = arith.constant 0 : index
    %c0_79 = arith.constant 0 : index
    %180 = vector.load %arg8[%c0_78, %c0_79] : memref<128x128xbf16, #tpu.memory_space<vmem>>, vector<128x128xbf16>
    %cst_80 = arith.constant dense<0.000000e+00> : vector<8x128xf32>
    %181 = tpu.matmul %179, %180, %cst_80 {dimension_numbers = #tpu.dot_dimension_numbers<[1], [0], [0], [1], [0, 0, 1, 1], [], []>} : vector<8x128xbf16>, vector<128x128xbf16>, vector<8x128xf32> -> vector<8x128xf32>
    %182 = arith.addf %178, %181 : vector<8x128xf32>
    %183 = arith.mulf %182, %30 : vector<8x128xf32>
    %184 = arith.negf %183 : vector<8x128xf32>
    %185 = math.exp %184 : vector<8x128xf32>
    %cst_81 = arith.constant 1.000000e+00 : f32
    %186 = vector.broadcast %cst_81 : f32 to vector<8x128xf32>
    %187 = arith.addf %186, %185 : vector<8x128xf32>
    %188 = arith.divf %186, %187 : vector<8x128xf32>
    %189 = arith.mulf %188, %30 : vector<8x128xf32>
    %190 = arith.addf %189, %33 : vector<8x128xf32>
    %c64_i32_82 = arith.constant 64 : i32
    %191 = tpu.dynamic_rotate %190 by %c64_i32_82 dim 1 : vector<8x128xf32>, i32 -> vector<8x128xf32>
    %192 = arith.mulf %190, %191 : vector<8x128xf32>
    %193 = arith.mulf %190, %169 : vector<8x128xf32>
    %c32_i32_83 = arith.constant 32 : i32
    %194 = tpu.dynamic_rotate %192 by %c32_i32_83 dim 1 : vector<8x128xf32>, i32 -> vector<8x128xf32>
    %195 = arith.addf %193, %194 : vector<8x128xf32>
    %cst_84 = arith.constant 0.000000e+00 : f32
    %196 = vector.broadcast %cst_84 : f32 to vector<8x128xf32>
    %197 = arith.select %27, %195, %196 : vector<8x128xi1>, vector<8x128xf32>
    %198 = math.tanh %197 : vector<8x128xf32>
    %199 = arith.mulf %191, %198 : vector<8x128xf32>
    %200 = arith.index_cast %c5_i32 : i32 to index
    %c0_85 = arith.constant 0 : index
    %c0_86 = arith.constant 0 : index
    %201 = vector.load %arg14[%200, %c0_85, %c0_86] : memref<8x8x128xf32, #tpu.memory_space<vmem>>, vector<1x8x128xf32>
    %202 = vector.shape_cast %201 : vector<1x8x128xf32> to vector<8x128xf32>
    %203 = vector.shape_cast %199 : vector<8x128xf32> to vector<1x8x128xf32>
    tpu.vector_store %arg14[%200, %c0_85, %c0_86], %203 {strides = array<i32>} : memref<8x8x128xf32, #tpu.memory_space<vmem>>, vector<1x8x128xf32>,
    %c6_i32 = arith.constant 6 : i32
    %204 = arith.index_cast %c6_i32 : i32 to index
    %c0_87 = arith.constant 0 : index
    %c0_88 = arith.constant 0 : index
    %205 = vector.load %arg13[%204, %c0_87, %c0_88] : memref<8x8x128xf32, #tpu.memory_space<vmem>>, vector<1x8x128xf32>
    %206 = vector.shape_cast %205 : vector<1x8x128xf32> to vector<8x128xf32>
    %207 = arith.truncf %199 : vector<8x128xf32> to vector<8x128xbf16>
    %c0_89 = arith.constant 0 : index
    %c0_90 = arith.constant 0 : index
    %208 = vector.load %arg8[%c0_89, %c0_90] : memref<128x128xbf16, #tpu.memory_space<vmem>>, vector<128x128xbf16>
    %cst_91 = arith.constant dense<0.000000e+00> : vector<8x128xf32>
    %209 = tpu.matmul %207, %208, %cst_91 {dimension_numbers = #tpu.dot_dimension_numbers<[1], [0], [0], [1], [0, 0, 1, 1], [], []>} : vector<8x128xbf16>, vector<128x128xbf16>, vector<8x128xf32> -> vector<8x128xf32>
    %210 = arith.addf %206, %209 : vector<8x128xf32>
    %211 = arith.mulf %210, %30 : vector<8x128xf32>
    %212 = arith.negf %211 : vector<8x128xf32>
    %213 = math.exp %212 : vector<8x128xf32>
    %cst_92 = arith.constant 1.000000e+00 : f32
    %214 = vector.broadcast %cst_92 : f32 to vector<8x128xf32>
    %215 = arith.addf %214, %213 : vector<8x128xf32>
    %216 = arith.divf %214, %215 : vector<8x128xf32>
    %217 = arith.mulf %216, %30 : vector<8x128xf32>
    %218 = arith.addf %217, %33 : vector<8x128xf32>
    %c64_i32_93 = arith.constant 64 : i32
    %219 = tpu.dynamic_rotate %218 by %c64_i32_93 dim 1 : vector<8x128xf32>, i32 -> vector<8x128xf32>
    %220 = arith.mulf %218, %219 : vector<8x128xf32>
    %221 = arith.mulf %218, %197 : vector<8x128xf32>
    %c32_i32_94 = arith.constant 32 : i32
    %222 = tpu.dynamic_rotate %220 by %c32_i32_94 dim 1 : vector<8x128xf32>, i32 -> vector<8x128xf32>
    %223 = arith.addf %221, %222 : vector<8x128xf32>
    %cst_95 = arith.constant 0.000000e+00 : f32
    %224 = vector.broadcast %cst_95 : f32 to vector<8x128xf32>
    %225 = arith.select %27, %223, %224 : vector<8x128xi1>, vector<8x128xf32>
    %226 = math.tanh %225 : vector<8x128xf32>
    %227 = arith.mulf %219, %226 : vector<8x128xf32>
    %228 = arith.index_cast %c6_i32 : i32 to index
    %c0_96 = arith.constant 0 : index
    %c0_97 = arith.constant 0 : index
    %229 = vector.load %arg14[%228, %c0_96, %c0_97] : memref<8x8x128xf32, #tpu.memory_space<vmem>>, vector<1x8x128xf32>
    %230 = vector.shape_cast %229 : vector<1x8x128xf32> to vector<8x128xf32>
    %231 = vector.shape_cast %227 : vector<8x128xf32> to vector<1x8x128xf32>
    tpu.vector_store %arg14[%228, %c0_96, %c0_97], %231 {strides = array<i32>} : memref<8x8x128xf32, #tpu.memory_space<vmem>>, vector<1x8x128xf32>,
    %c7_i32 = arith.constant 7 : i32
    %232 = arith.index_cast %c7_i32 : i32 to index
    %c0_98 = arith.constant 0 : index
    %c0_99 = arith.constant 0 : index
    %233 = vector.load %arg13[%232, %c0_98, %c0_99] : memref<8x8x128xf32, #tpu.memory_space<vmem>>, vector<1x8x128xf32>
    %234 = vector.shape_cast %233 : vector<1x8x128xf32> to vector<8x128xf32>
    %235 = arith.truncf %227 : vector<8x128xf32> to vector<8x128xbf16>
    %c0_100 = arith.constant 0 : index
    %c0_101 = arith.constant 0 : index
    %236 = vector.load %arg8[%c0_100, %c0_101] : memref<128x128xbf16, #tpu.memory_space<vmem>>, vector<128x128xbf16>
    %cst_102 = arith.constant dense<0.000000e+00> : vector<8x128xf32>
    %237 = tpu.matmul %235, %236, %cst_102 {dimension_numbers = #tpu.dot_dimension_numbers<[1], [0], [0], [1], [0, 0, 1, 1], [], []>} : vector<8x128xbf16>, vector<128x128xbf16>, vector<8x128xf32> -> vector<8x128xf32>
    %238 = arith.addf %234, %237 : vector<8x128xf32>
    %239 = arith.mulf %238, %30 : vector<8x128xf32>
    %240 = arith.negf %239 : vector<8x128xf32>
    %241 = math.exp %240 : vector<8x128xf32>
    %cst_103 = arith.constant 1.000000e+00 : f32
    %242 = vector.broadcast %cst_103 : f32 to vector<8x128xf32>
    %243 = arith.addf %242, %241 : vector<8x128xf32>
    %244 = arith.divf %242, %243 : vector<8x128xf32>
    %245 = arith.mulf %244, %30 : vector<8x128xf32>
    %246 = arith.addf %245, %33 : vector<8x128xf32>
    %c64_i32_104 = arith.constant 64 : i32
    %247 = tpu.dynamic_rotate %246 by %c64_i32_104 dim 1 : vector<8x128xf32>, i32 -> vector<8x128xf32>
    %248 = arith.mulf %246, %247 : vector<8x128xf32>
    %249 = arith.mulf %246, %225 : vector<8x128xf32>
    %c32_i32_105 = arith.constant 32 : i32
    %250 = tpu.dynamic_rotate %248 by %c32_i32_105 dim 1 : vector<8x128xf32>, i32 -> vector<8x128xf32>
    %251 = arith.addf %249, %250 : vector<8x128xf32>
    %cst_106 = arith.constant 0.000000e+00 : f32
    %252 = vector.broadcast %cst_106 : f32 to vector<8x128xf32>
    %253 = arith.select %27, %251, %252 : vector<8x128xi1>, vector<8x128xf32>
    %254 = math.tanh %253 : vector<8x128xf32>
    %255 = arith.mulf %247, %254 : vector<8x128xf32>
    %256 = arith.index_cast %c7_i32 : i32 to index
    %c0_107 = arith.constant 0 : index
    %c0_108 = arith.constant 0 : index
    %257 = vector.load %arg14[%256, %c0_107, %c0_108] : memref<8x8x128xf32, #tpu.memory_space<vmem>>, vector<1x8x128xf32>
    %258 = vector.shape_cast %257 : vector<1x8x128xf32> to vector<8x128xf32>
    %259 = vector.shape_cast %255 : vector<8x128xf32> to vector<1x8x128xf32>
    tpu.vector_store %arg14[%256, %c0_107, %c0_108], %259 {strides = array<i32>} : memref<8x8x128xf32, #tpu.memory_space<vmem>>, vector<1x8x128xf32>,
    %c8_i32 = arith.constant 8 : i32
    %c0_109 = arith.constant 0 : index
    %c0_110 = arith.constant 0 : index
    %c0_111 = arith.constant 0 : index
    %260 = vector.load %arg14[%c0_109, %c0_110, %c0_111] : memref<8x8x128xf32, #tpu.memory_space<vmem>>, vector<8x8x128xf32>
    %261 = vector.shape_cast %260 : vector<8x8x128xf32> to vector<64x128xf32>
    %262 = arith.truncf %261 : vector<64x128xf32> to vector<64x128xbf16>
    %c0_112 = arith.constant 0 : index
    %c0_113 = arith.constant 0 : index
    %263 = vector.load %arg9[%c0_112, %c0_113] : memref<128x128xbf16, #tpu.memory_space<vmem>>, vector<128x128xbf16>
    %cst_114 = arith.constant dense<0.000000e+00> : vector<64x128xf32>
    %264 = tpu.matmul %262, %263, %cst_114 {dimension_numbers = #tpu.dot_dimension_numbers<[1], [0], [0], [1], [0, 0, 1, 1], [], []>} : vector<64x128xbf16>, vector<128x128xbf16>, vector<64x128xf32> -> vector<64x128xf32>
    %c0_115 = arith.constant 0 : index
    %c0_116 = arith.constant 0 : index
    %265 = vector.load %arg10[%c0_115, %c0_116] : memref<1x128xf32, #tpu.memory_space<vmem>>, vector<1x128xf32>
    %266 = vector.broadcast %265 : vector<1x128xf32> to vector<64x128xf32>
    %267 = arith.addf %264, %266 : vector<64x128xf32>
    %c0_117 = arith.constant 0 : index
    %c0_118 = arith.constant 0 : index
    %268 = vector.load %arg3[%c0_117, %c0_118] : memref<64x128xf32, #tpu.memory_space<vmem>>, vector<64x128xf32>
    %c0_119 = arith.constant 0 : index
    %c0_120 = arith.constant 0 : index
    %269 = vector.load %arg2[%c0_119, %c0_120] : memref<64x128xf32, #tpu.memory_space<vmem>>, vector<64x128xf32>
    %cst_121 = arith.constant 1.000000e+00 : f32
    %270 = vector.broadcast %cst_121 : f32 to vector<64x128xf32>
    %271 = arith.subf %270, %268 : vector<64x128xf32>
    %272 = arith.mulf %268, %269 : vector<64x128xf32>
    %273 = arith.mulf %271, %267 : vector<64x128xf32>
    %274 = arith.addf %272, %273 : vector<64x128xf32>
    %c0_122 = arith.constant 0 : index
    %c0_123 = arith.constant 0 : index
    %275 = vector.load %arg11[%c0_122, %c0_123] : memref<64x128xf32, #tpu.memory_space<vmem>>, vector<64x128xf32>
    tpu.vector_store %arg11[%c0_122, %c0_123], %274 {strides = array<i32>} : memref<64x128xf32, #tpu.memory_space<vmem>>, vector<64x128xf32>,
    %276 = arith.subf %274, %269 : vector<64x128xf32>
    %277 = arith.mulf %276, %271 : vector<64x128xf32>
    %278 = math.absf %277 : vector<64x128xf32>
    %279 = tpu.iota {dimensions = array<i32: 1>} : vector<64x128xi32>
    %c3_i32_124 = arith.constant 3 : i32
    %280 = vector.broadcast %c3_i32_124 : i32 to vector<64x128xi32>
    %281 = arith.andi %279, %280 : vector<64x128xi32>
    %c2_i32_125 = arith.constant 2 : i32
    %282 = vector.broadcast %c2_i32_125 : i32 to vector<64x128xi32>
    %283 = arith.cmpi slt, %281, %282 : vector<64x128xi32>
    %cst_126 = arith.constant 0.000000e+00 : f32
    %284 = vector.broadcast %cst_126 : f32 to vector<64x128xf32>
    %285 = arith.select %283, %278, %284 : vector<64x128xi1>, vector<64x128xf32>
    %286 = vector.shape_cast %285 : vector<64x128xf32> to vector<1x64x128xf32>
    %cst_127 = arith.constant dense<0.000000e+00> : vector<1xf32>
    %287 = vector.multi_reduction <add>, %286, %cst_127 [1, 2] : vector<1x64x128xf32> to vector<1xf32>
    %288 = vector.shape_cast %287 : vector<1xf32> to vector<1x1x1xf32>
    %289 = vector.extract %288[0, 0, 0] : f32 from vector<1x1x1xf32>
    %cst_128 = arith.constant 0.000000e+00 : f32
    %290 = vector.broadcast %cst_128 : f32 to vector<64x128xf32>
    %291 = arith.select %283, %271, %290 : vector<64x128xi1>, vector<64x128xf32>
    %292 = vector.shape_cast %291 : vector<64x128xf32> to vector<1x64x128xf32>
    %cst_129 = arith.constant dense<0.000000e+00> : vector<1xf32>
    %293 = vector.multi_reduction <add>, %292, %cst_129 [1, 2] : vector<1x64x128xf32> to vector<1xf32>
    %294 = vector.shape_cast %293 : vector<1xf32> to vector<1x1x1xf32>
    %295 = vector.extract %294[0, 0, 0] : f32 from vector<1x1x1xf32>
    %296 = vector.shape_cast %278 : vector<64x128xf32> to vector<1x64x128xf32>
    %cst_130 = arith.constant dense<0.000000e+00> : vector<1xf32>
    %297 = vector.multi_reduction <add>, %296, %cst_130 [1, 2] : vector<1x64x128xf32> to vector<1xf32>
    %298 = vector.shape_cast %297 : vector<1xf32> to vector<1x1x1xf32>
    %299 = vector.extract %298[0, 0, 0] : f32 from vector<1x1x1xf32>
    %300 = vector.shape_cast %271 : vector<64x128xf32> to vector<1x64x128xf32>
    %cst_131 = arith.constant dense<0.000000e+00> : vector<1xf32>
    %301 = vector.multi_reduction <add>, %300, %cst_131 [1, 2] : vector<1x64x128xf32> to vector<1xf32>
    %302 = vector.shape_cast %301 : vector<1xf32> to vector<1x1x1xf32>
    %303 = vector.extract %302[0, 0, 0] : f32 from vector<1x1x1xf32>
    %c0_132 = arith.constant 0 : index
    %304 = memref.load %arg12[%c0_132] : memref<4xf32, #tpu.memory_space<smem>>
    memref.store %289, %arg12[%c0_132] : memref<4xf32, #tpu.memory_space<smem>>
    %c1 = arith.constant 1 : index
    %305 = memref.load %arg12[%c1] : memref<4xf32, #tpu.memory_space<smem>>
    memref.store %295, %arg12[%c1] : memref<4xf32, #tpu.memory_space<smem>>
    %306 = arith.subf %299, %289 : f32
    %c2 = arith.constant 2 : index
    %307 = memref.load %arg12[%c2] : memref<4xf32, #tpu.memory_space<smem>>
    memref.store %306, %arg12[%c2] : memref<4xf32, #tpu.memory_space<smem>>
    %308 = arith.subf %303, %295 : f32
    %c3 = arith.constant 3 : index
    %309 = memref.load %arg12[%c3] : memref<4xf32, #tpu.memory_space<smem>>
    memref.store %308, %arg12[%c3] : memref<4xf32, #tpu.memory_space<smem>>
    return
  }
  func.func @transform_0(%arg0: i32) -> (i32, i32) {
    %c0_i32 = arith.constant 0 : i32
    %c0_i32_0 = arith.constant 0 : i32
    %c0_i32_1 = arith.constant 0 : i32
    return %c0_i32, %c0_i32_0 : i32, i32
  }
  func.func @transform_1(%arg0: i32) -> (i32, i32) {
    %c0_i32 = arith.constant 0 : i32
    %c0_i32_0 = arith.constant 0 : i32
    %c0_i32_1 = arith.constant 0 : i32
    return %c0_i32, %c0_i32_0 : i32, i32
  }
  func.func @transform_2(%arg0: i32) -> (i32, i32) {
    %c0_i32 = arith.constant 0 : i32
    %c0_i32_0 = arith.constant 0 : i32
    %c0_i32_1 = arith.constant 0 : i32
    return %c0_i32, %c0_i32_0 : i32, i32
  }
  func.func @transform_3(%arg0: i32) -> (i32, i32) {
    %c0_i32 = arith.constant 0 : i32
    %c0_i32_0 = arith.constant 0 : i32
    %c0_i32_1 = arith.constant 0 : i32
    return %c0_i32, %c0_i32_0 : i32, i32
  }
  func.func @transform_4(%arg0: i32) -> (i32, i32) {
    %c0_i32 = arith.constant 0 : i32
    %c0_i32_0 = arith.constant 0 : i32
    %c0_i32_1 = arith.constant 0 : i32
    return %c0_i32, %c0_i32_0 : i32, i32
  }
  func.func @transform_5(%arg0: i32) -> (i32, i32) {
    %c0_i32 = arith.constant 0 : i32
    %c0_i32_0 = arith.constant 0 : i32
    %c0_i32_1 = arith.constant 0 : i32
    return %c0_i32, %c0_i32_0 : i32, i32
  }
  func.func @transform_6(%arg0: i32) -> (i32, i32) {
    %c0_i32 = arith.constant 0 : i32
    %c0_i32_0 = arith.constant 0 : i32
    %c0_i32_1 = arith.constant 0 : i32
    return %c0_i32, %c0_i32_0 : i32, i32
  }
  func.func @transform_7(%arg0: i32) -> (i32, i32) {
    %c0_i32 = arith.constant 0 : i32
    %c0_i32_0 = arith.constant 0 : i32
    %c0_i32_1 = arith.constant 0 : i32
    return %c0_i32, %c0_i32_0 : i32, i32
  }
  func.func @transform_8(%arg0: i32) -> (i32, i32) {
    %c0_i32 = arith.constant 0 : i32
    %c0_i32_0 = arith.constant 0 : i32
    %c0_i32_1 = arith.constant 0 : i32
    return %c0_i32, %c0_i32_0 : i32, i32
  }
  func.func @transform_9(%arg0: i32) -> (i32, i32) {
    %c0_i32 = arith.constant 0 : i32
    %c0_i32_0 = arith.constant 0 : i32
    %c0_i32_1 = arith.constant 0 : i32
    return %c0_i32, %c0_i32_0 : i32, i32
  }
  func.func @transform_10(%arg0: i32) -> (i32, i32) {
    %c0_i32 = arith.constant 0 : i32
    %c0_i32_0 = arith.constant 0 : i32
    %c0_i32_1 = arith.constant 0 : i32
    return %c0_i32, %c0_i32_0 : i32, i32
  }
  func.func @transform_11(%arg0: i32) -> i32 {
    %c0_i32 = arith.constant 0 : i32
    %c0_i32_0 = arith.constant 0 : i32
    return %c0_i32 : i32
  }
}

</mosaic_0001>

<bundles_post_ra>
// kernel: tpu_custom_call.1
= control target key start
LH: loop header
LB: loop body
LE: loop exit
PB: predicated region body
PF: predicated region fallthrough
CT: control target
= control target key end

     0   :  { %17 = vsyncpa [#allocation5], 0  ;;  %s2517_s0 = inlined_call_operand.vmem [shape: f32[64,18], index: 0, kind: input, shape index: {}]   ;;  %s2518_s1 = inlined_call_operand.vmem [shape: f32[64,128], index: 1, kind: input, shape index: {}]   ;;  %s2519_s2 = inlined_call_operand.hbm [shape: f32[64,128], index: 2, kind: input, shape index: {}]   ;;  %s2520_s3 = inlined_call_operand.hbm [shape: bf16[18,32], index: 3, kind: input, shape index: {}]   ;;  %s2521_s4 = inlined_call_operand.vmem [shape: f32[1,32], index: 4, kind: input, shape index: {}]   ;;  %s2522_s5 = inlined_call_operand.vmem [shape: bf16[32,128], index: 5, kind: input, shape index: {}]   ;;  %s2523_s6 = inlined_call_operand.vmem [shape: f32[1,128], index: 6, kind: input, shape index: {}]   ;;  %s2524_s7 = inlined_call_operand.hbm [shape: bf16[128,128], index: 7, kind: input, shape index: {}]   ;;  %s2525_s8 = inlined_call_operand.hbm [shape: bf16[128,128], index: 8, kind: input, shape index: {}]   ;;  %s2526_s9 = inlined_call_operand.vmem [shape: f32[1,128], index: 9, kind: input, shape index: {}]   ;;  %s2527_s10 = inlined_call_operand.hbm [shape: f32[64,128], index: 10, kind: output, shape index: {0}]   ;;  %s2528_s11 = inlined_call_operand.hbm [shape: f32[4], index: 11, kind: output, shape index: {1}]  }
   0x1   :  { %18 = vsyncpa [#allocation9], 0 }
   0x2   :  { %19 = vsyncpa [#allocation12], 0 }
   0x3   :  { %20 = vsyncpa [#allocation6], 0  ;;  %s43_s19 = sshll.u32 %s2520_s3, 4  ;;  %s44_s19 = int_to_ptr.hbm [resolvable:$true] %s43_s19 }
   0x4   :  { %21 = vsyncpa [#allocation7], 0  ;;  %s2112_s20 = smov [#allocation8]   ;;  %s30_s24 = sshll.u32 %s2519_s2, 4  ;;  %s31_s24 = int_to_ptr.hbm [resolvable:$true] %s30_s24 }
   0x5   :  { %s45_s21 = sshll.u32 %s2112_s20, 4  ;;  %s2113_s25 = smov 64   ;;  %s46_s21 = int_to_ptr.vmem [resolvable:$true] %s45_s21 }
   0x6   :  { %s2114_s26 = smov 4   ;;  %s2115_s27 = smov [#allocation4]  }
   0x7   :  { %51 = dma.hbm_to_vmem [thread:$0]  %s44_s19, 192, %s46_s21, [#allocation9], %s2113_s25, %s2113_s25, %s2114_s26  }
   0x8   :  { %s32_s28 = sshll.u32 %s2115_s27, 4  ;;  %s2116_s29 = smov 128   ;;  %s33_s28 = int_to_ptr.vmem [resolvable:$true] %s32_s28 }
   0x9   :  { %s2117_s3 = smov 8   ;;  %s62_s13 = sshll.u32 %s2524_s7, 4  ;;  %s63_s13 = int_to_ptr.hbm [resolvable:$true] %s62_s13 }
   0xa   :  { %38 = dma.hbm_to_vmem [thread:$0]  %s31_s24, 1024, %s33_s28, [#allocation5], %s2116_s29, %s2116_s29, %s2117_s3  }
   0xb   :  { %s2118_s2 = smov [#allocation10]   ;;  %s75_s17 = sshll.u32 %s2525_s8, 4  ;;  %s76_s17 = int_to_ptr.hbm [resolvable:$true] %s75_s17 }
   0xc   :  { %s64_s14 = sshll.u32 %s2118_s2, 4  ;;  %s2119_s18 = smov [#allocation11]   ;;  %s65_s14 = int_to_ptr.vmem [resolvable:$true] %s64_s14 }
   0xd   :  { %70 = dma.hbm_to_vmem [thread:$0]  %s63_s13, 1024, %s65_s14, [#allocation9], %s2113_s25, %s2113_s25, %s2114_s26  }
   0xe   :  { %s77_s19 = sshll.u32 %s2119_s18, 4  ;;  %s78_s19 = int_to_ptr.vmem [resolvable:$true] %s77_s19 }
   0xf   :  { %83 = dma.hbm_to_vmem [thread:$0]  %s76_s17, 1024, %s78_s19, [#allocation12], %s2113_s25, %s2113_s25, %s2114_s26  }
  0x10   :  { %2102 = dma.done.wait [#allocation5], 1024  }
  0x11   :  { %2103 = vsyncadd [#allocation5], 4294966272 }
  0x12   :  { %2104 = dma.done.wait [#allocation9], 1216  }
  0x13   :  { %2105 = vsyncadd [#allocation9], 4294966080 }
  0x14   :  { %2106 = dma.done.wait [#allocation12], 1024  }
  0x15   :  { %2107 = vsyncadd [#allocation12], 4294966272  ;;  %v117_v0 = vld [vmem:[#allocation8 + $0x8] sm:$0x1]  ;;  %vm144_vm0 = vcmask 1040384   ;;  %v1819_v3 = vld [vmem:[#allocation8] sm:$0xff]  ;;  %v259_v59 = vlaneseq }
  0x16   :  { %v127_v1 = vunpack.c.l.b16 %v117_v0  ;;  %v103_v5 = vld [vmem:[%s2517_s0] sm:$0xff]  ;;  %v104_v6 = vld [vmem:[%s2517_s0 + $0x8] sm:$0xff]  ;;  %vm131_vm1 = vcmask 146432   ;;  %v1827_v15 = vld [vmem:[#allocation10 + $0x28] sm:$0xff]  ;;  %v2120_v27 = vmov 0   ;;  %vm209_vm2 = vcmask 261120  }
  0x17   :  { %v107_v7 = vld [vmem:[%s2517_s0 + $0x20] sm:$0xff]  ;;  %v108_v8 = vld [vmem:[%s2517_s0 + $0x28] sm:$0xff]  ;;  %v111_v11 = vpack.c.bf16 %v104_v6, %v103_v5  ;;  %v105_v17 = vld [vmem:[%s2517_s0 + $0x10] sm:$0xff]  ;;  %v2248_v60 = vand.u32 127, %v259_v59  ;;  %s2123_s8 = smov 32   ;;  %s2125_s24 = smov [#allocation14]  }
  0x18   :  { %v129_v2 = vpack.c.b16 %v127_v1, %v127_v1  ;;  %v1829_v9 = vld [vmem:[#allocation10 + $0x38] sm:$0xff]  ;;  %v113_v12 = vpack.c.bf16 %v108_v8, %v107_v7  ;;  %v1828_v13 = vld [vmem:[#allocation10 + $0x30] sm:$0xff]  ;;  %v1826_v16 = vld [vmem:[#allocation10 + $0x20] sm:$0xff]  ;;  %v2121_v1 = vmov 1.0  }
  0x19   :  { %v1821_v10 = vld [vmem:[%s2522_s5 + $0x8] sm:$0xff]  ;;  %v1820_v14 = vld [vmem:[%s2522_s5] sm:$0xff]  ;;  %v106_v18 = vld [vmem:[%s2517_s0 + $0x18] sm:$0xff]  ;;  %vm261_vm3 = vcmp.ge.s32.totalorder %v2248_v60, 64  ;;  %vm262_vm4 = vcmp.lt.s32.totalorder %v2248_v60, 96  ;;  %vm264_vm10 = vcmp.ge.s32.totalorder %v2248_v60, 32 }
  0x1a   :  { %v146_v4 = vsel %vm144_vm0, %v129_v2, 0  ;;  %v109_v19 = vld [vmem:[%s2517_s0 + $0x30] sm:$0xff]  ;;  %v110_v20 = vld [vmem:[%s2517_s0 + $0x38] sm:$0xff]  ;;  %v1825_v21 = vld [vmem:[#allocation10 + $0x18] sm:$0xff]  ;;  %v112_v22 = vpack.c.bf16 %v106_v18, %v105_v17  ;;  %vm265_vm11 = vcmp.lt.s32.totalorder %v2248_v60, 64 }
  0x1b   :  { %154 = vmatpush.bf16.msra.mxu1 %v146_v4  ;;  %1894 = vmatpush.bf16.msra.mxu2 %v146_v4  ;;  %v114_v23 = vpack.c.bf16 %v110_v20, %v109_v19  ;;  %v1824_v24 = vld [vmem:[#allocation10 + $0x10] sm:$0xff]  ;;  %v1823_v25 = vld [vmem:[#allocation10 + $0x8] sm:$0xff]  ;;  %v1822_v26 = vld [vmem:[#allocation10] sm:$0xff] }
  0x1c   :  { %v1918_v29 = vld [vmem:[%s2521_s4] ss:$0 sm:$0xff]  ;;  %vm2257_vm5 = vmand %vm261_vm3, %vm262_vm4  ;;  %s1473_s4 = sshll.u32 %s2527_s10, 4  ;;  %s1474_s4 = int_to_ptr.hbm [resolvable:$true] %s1473_s4 }
  0x1d   :  { %v2255_v61 = vld [vmem:[%s2523_s6] ss:$0 sm:$0xff]  ;;  %v2264_v2 = vsel %vm2257_vm5, 2.0, %v2121_v1  ;;  %vm2288_vm12 = vmand %vm264_vm10, %vm265_vm11 }
  0x1f   :  { %155 = vmatpush.bf16.msra.mxu1 %v1819_v3  ;;  %1895 = vmatpush.bf16.msra.mxu2 %v1819_v3 }
  0x22   :  { %1507 = vmatmul.msk.bf16.vlgmr.msra.gmra.mxu1 %vm131_vm1, %v111_v11  ;;  %1509 = vmatmul.msk.bf16.vlgmr.msra.gmra.mxu2 %vm131_vm1, %v113_v12 }
  0x23   :  { %334 = vmatpush.bf16.msrb.mxu2 %v1829_v9  ;;  %228 = vmatpush.bf16.msrb.mxu1 %v1821_v10 }
  0x27   :  { %335 = vmatpush.bf16.msrb.mxu2 %v1828_v13  ;;  %229 = vmatpush.bf16.msrb.mxu1 %v1820_v14 }
  0x2b   :  { %336 = vmatpush.bf16.msrb.mxu2 %v1827_v15 }
  0x2f   :  { %337 = vmatpush.bf16.msrb.mxu2 %v1826_v16 }
  0x32   :  { %1508 = vmatmul.msk.bf16.gmra.mxu1 %vm131_vm1, %v112_v22  ;;  %1510 = vmatmul.msk.bf16.gmra.mxu2 %vm131_vm1, %v114_v23 }
  0x33   :  { %338 = vmatpush.bf16.msrb.mxu2 %v1825_v21  ;;  %v2122_v21 = vmov 0.0  }
  0x34   :  { %v2275_v22 = vsel %vm2257_vm5, -1.0, %v2122_v21 }
  0x37   :  { %339 = vmatpush.bf16.msrb.mxu2 %v1824_v24 }
  0x3b   :  { %340 = vmatpush.bf16.msrb.mxu2 %v1823_v25 }
  0x3f   :  { %341 = vmatpush.bf16.msrb.mxu2 %v1822_v26 }
  0x42   :  { %342 = vmatmul.bf16.vlgmr.msrb.gmra.mxu2 %v2120_v27 }
  0x9f   :  { %v157_v28 = vpop.f32.mrf.mxu1 }
  0xa0   :  { %v158_v30 = vadd.f32 %v1918_v29, %v157_v28 }
  0xa2   :  { %v177_v33 = vmax.f32 %v158_v30, 0.0  ;;  %v1836_v30 = vld [vmem:[#allocation10 + $0x30] sm:$0xff] }
  0xa5   :  { %v167_v37 = vpop.f32.mrf.mxu2 }
  0xa6   :  { %v168_v45 = vadd.f32 %v1918_v29, %v167_v37  ;;  %v1831_v37 = vld [vmem:[#allocation10 + $0x8] sm:$0xff] }
  0xa7   :  { %v159_v31 = vpop.f32.mrf.mxu1 }
  0xa8   :  { %v160_v32 = vadd.f32 %v1918_v29, %v159_v31  ;;  %v181_v48 = vmax.f32 %v168_v45, 0.0  ;;  %v1835_v31 = vld [vmem:[#allocation10 + $0x28] sm:$0xff] }
  0xaa   :  { %v178_v34 = vmax.f32 %v160_v32, 0.0  ;;  %v1834_v32 = vld [vmem:[#allocation10 + $0x20] sm:$0xff] }
  0xac   :  { %v185_v35 = vpack.c.bf16 %v178_v34, %v177_v33  ;;  %v1833_v33 = vld [vmem:[#allocation10 + $0x18] sm:$0xff] }
  0xad   :  { %v169_v43 = vpop.f32.mrf.mxu2 }
  0xae   :  { %1519 = vmatmul.msk.bf16.vlgmr.msrb.gmra.mxu1 %vm209_vm2, %v185_v35  ;;  %v170_v46 = vadd.f32 %v1918_v29, %v169_v43 }
  0xaf   :  { %v162_v36 = vpop.f32.mrf.mxu1 }
  0xb0   :  { %v163_v38 = vadd.f32 %v1918_v29, %v162_v36  ;;  %v182_v49 = vmax.f32 %v170_v46, 0.0  ;;  %v1832_v36 = vld [vmem:[#allocation10 + $0x10] sm:$0xff] }
  0xb2   :  { %v179_v40 = vmax.f32 %v163_v38, 0.0  ;;  %v187_v50 = vpack.c.bf16 %v182_v49, %v181_v48  ;;  %v1830_v38 = vld [vmem:[#allocation10] sm:$0xff] }
  0xb5   :  { %v172_v47 = vpop.f32.mrf.mxu2 }
  0xb6   :  { %v173_v52 = vadd.f32 %v1918_v29, %v172_v47 }
  0xb7   :  { %v164_v39 = vpop.f32.mrf.mxu1 }
  0xb8   :  { %v165_v41 = vadd.f32 %v1918_v29, %v164_v39  ;;  %v183_v54 = vmax.f32 %v173_v52, 0.0 }
  0xba   :  { %v180_v42 = vmax.f32 %v165_v41, 0.0 }
  0xbc   :  { %v186_v44 = vpack.c.bf16 %v180_v42, %v179_v40 }
  0xbd   :  { %v174_v51 = vpop.f32.mrf.mxu2 }
  0xbe   :  { %1520 = vmatmul.msk.bf16.gmra.mxu1 %vm209_vm2, %v186_v44  ;;  %v175_v53 = vadd.f32 %v1918_v29, %v174_v51  ;;  %v1837_v29 = vld [vmem:[#allocation10 + $0x38] sm:$0xff] }
  0xbf   :  { %448 = vmatpush.bf16.msra.mxu3 %v1837_v29 }
  0xc0   :  { %v184_v55 = vmax.f32 %v175_v53, 0.0 }
  0xc2   :  { %v188_v56 = vpack.c.bf16 %v184_v55, %v183_v54 }
  0xc3   :  { %449 = vmatpush.bf16.msra.mxu3 %v1836_v30 }
  0xc5   :  { %v343_v57 = vpop.f32.mrf.mxu2 }
  0xc7   :  { %450 = vmatpush.bf16.msra.mxu3 %v1835_v31 }
  0xcb   :  { %451 = vmatpush.bf16.msra.mxu3 %v1834_v32 }
  0xcd   :  { %v345_v58 = vpop.f32.mrf.mxu2 }
  0xce   :  { %1521 = vmatmul.msk.bf16.gmra.mxu1 %vm209_vm2, %v187_v50 }
  0xcf   :  { %452 = vmatpush.bf16.msra.mxu3 %v1833_v33 }
  0xd3   :  { %453 = vmatpush.bf16.msra.mxu3 %v1832_v36 }
  0xd7   :  { %454 = vmatpush.bf16.msra.mxu3 %v1831_v37 }
  0xdb   :  { %455 = vmatpush.bf16.msra.mxu3 %v1830_v38 }
  0xde   :  { %1522 = vmatmul.msk.bf16.gmra.mxu1 %vm209_vm2, %v188_v56 }
 0x12b   :  { %v231_v63 = vpop.f32.mrf.mxu1 }
 0x12c   :  { %v232_v0 = vadd.f32 %v2255_v61, %v231_v63 }
 0x12e   :  { %v347_v3 = vadd.f32 %v343_v57, %v232_v0 }
 0x130   :  { %v348_v4 = vmul.f32 %v347_v3, %v2264_v2 }
 0x132   :  { %v1555_v5 = vmul.f32 -1.442695, %v348_v4 }
 0x133   :  { %v233_v6 = vpop.f32.mrf.mxu1 }
 0x134   :  { %1921 = vpow2.f32 %v1555_v5  ;;  %v234_v47 = vadd.f32 %v2255_v61, %v233_v6  ;;  %v1845_v6 = vld [vmem:[#allocation10 + $0x38] sm:$0xff] }
 0x135   :  { %563 = vmatpush.bf16.msra.mxu2 %v1845_v6 }
 0x13a   :  { %v1922_v7 = vpop.eup %1921 }
 0x13b   :  { %v352_v8 = vadd.f32 1.0, %v1922_v7  ;;  %v2267_v9 = vpop.f32.mrf.mxu1  ;;  %v1844_v7 = vld [vmem:[#allocation10 + $0x30] sm:$0xff] }
 0x13c   :  { %564 = vmatpush.bf16.msra.mxu2 %v1844_v7  ;;  %v237_v29 = vadd.f32 %v2255_v61, %v2267_v9 }
 0x13d   :  { %1923 = vrcp.f32 %v352_v8  ;;  %v364_v14 = vand.u32 2147483648, %v352_v8  ;;  %v362_v16 = vand.u32 2147483647, %v352_v8  ;;  %vm358_vm7 = vweird.f32 %v352_v8 }
 0x13f   :  { %v365_v18 = vor.u32 1.1754944e-38, %v364_v14  ;;  %vm363_vm9 = vcmp.eq.f32.partialorder %v362_v16, 8.507059e+37  ;;  %v1839_v16 = vld [vmem:[#allocation10 + $0x8] sm:$0xff] }
 0x143   :  { %v1924_v10 = vpop.eup %1923  ;;  %v2269_v11 = vpop.f32.mrf.mxu1 }
 0x144   :  { %v354_v12 = vmul.f32 %v1924_v10, %v352_v8  ;;  %vm359_vm6 = vweird.f32 %v1924_v10  ;;  %v1843_v8 = vld [vmem:[#allocation10 + $0x28] sm:$0xff]  ;;  %v239_v6 = vadd.f32 %v2255_v61, %v2269_v11 }
 0x145   :  { %vm360_vm8 = vmor %vm358_vm7, %vm359_vm6  ;;  %565 = vmatpush.bf16.msra.mxu2 %v1843_v8 }
 0x146   :  { %v355_v13 = vsub.f32 1.0, %v354_v12  ;;  %v1841_v12 = vld [vmem:[#allocation10 + $0x18] sm:$0xff] }
 0x148   :  { %v356_v15 = vmul.f32 %v1924_v10, %v355_v13 }
 0x14a   :  { %v357_v17 = vadd.f32 %v1924_v10, %v356_v15  ;;  %v1840_v15 = vld [vmem:[#allocation10 + $0x10] sm:$0xff] }
 0x14b   :  { %v2271_v19 = vpop.f32.mrf.mxu1 }
 0x14c   :  { %v361_v20 = vsel %vm360_vm8, %v1924_v10, %v357_v17  ;;  %v1842_v10 = vld [vmem:[#allocation10 + $0x20] sm:$0xff] }
 0x14d   :  { %v366_v23 = vsel %vm363_vm9, %v365_v18, %v361_v20  ;;  %566 = vmatpush.bf16.msra.mxu2 %v1842_v10  ;;  %v1838_v17 = vld [vmem:[#allocation10] sm:$0xff] }
 0x14e   :  { %v368_v24 = vmul.f32 %v366_v23, %v2264_v2 }
 0x150   :  { %v369_v25 = vadd.f32 %v368_v24, %v2275_v22 }
 0x151   :  { %567 = vmatpush.bf16.msra.mxu2 %v1841_v12 }
 0x152   :  { %370 = vrot.lane.b32.xlu0 %v369_v25, %s2113_s25  ;;  %v373_v39 = vmul.f32 0.0, %v369_v25 }
 0x153   :  { %v2280_v26 = vpop.f32.mrf.mxu1 }
 0x155   :  { %568 = vmatpush.bf16.msra.mxu2 %v1840_v15 }
 0x159   :  { %569 = vmatpush.bf16.msra.mxu2 %v1839_v16 }
 0x15b   :  { %v246_v27 = vpop.f32.mrf.mxu1 }
 0x15c   :  { %v2283_v28 = vadd.f32 %v2255_v61, %v246_v27 }
 0x15d   :  { %570 = vmatpush.bf16.msra.mxu2 %v1838_v17 }
 0x1c4   :  { %v371_v34 = vpop.permute.xlu0 %370 }
 0x1c5   :  { %v372_v35 = vmul.f32 %v371_v34, %v369_v25 }
 0x1c7   :  { %374 = vrot.lane.b32.xlu0 %v372_v35, %s2123_s8 }
 0x239   :  { %v375_v41 = vpop.permute.xlu0 %374 }
 0x23a   :  { %v376_v42 = vadd.f32 %v375_v41, %v373_v39 }
 0x23c   :  { %v377_v43 = vsel %vm2288_vm12, %v376_v42, 0.0 }
 0x23d   :  { %1925 = vtanh.f32 %v377_v43 }
 0x243   :  { %v1926_v44 = vpop.eup %1925 }
 0x244   :  { %v2294_v45 = vmul.f32 %v1926_v44, %v371_v34 }
 0x246   :  { %v383_v46 = vpack.c.bf16 %v2294_v45, %v2294_v45 }
 0x248   :  { %456 = vmatmul.bf16.vlgmr.msra.gmra.mxu3 %v383_v46 }
 0x2cb   :  { %v457_v48 = vpop.f32.mrf.mxu3 }
 0x2cc   :  { %v461_v49 = vadd.f32 %v457_v48, %v234_v47 }
 0x2ce   :  { %v462_v50 = vmul.f32 %v461_v49, %v2264_v2 }
 0x2d0   :  { %v1588_v51 = vmul.f32 -1.442695, %v462_v50  ;;  %v1853_v50 = vld [vmem:[#allocation10 + $0x38] sm:$0xff] }
 0x2d1   :  { %678 = vmatpush.bf16.msrb.mxu3 %v1853_v50  ;;  %v1886_v50 = vld [vmem:[#allocation11] sm:$0xff] }
 0x2d2   :  { %1927 = vpow2.f32 %v1588_v51  ;;  %v1852_v51 = vld [vmem:[#allocation10 + $0x30] sm:$0xff] }
 0x2d3   :  { %v459_v52 = vpop.f32.mrf.mxu3 }
 0x2d4   :  { %v1851_v52 = vld [vmem:[#allocation10 + $0x28] sm:$0xff] }
 0x2d5   :  { %679 = vmatpush.bf16.msrb.mxu3 %v1852_v51 }
 0x2d8   :  { %v1928_v53 = vpop.eup %1927 }
 0x2d9   :  { %v466_v54 = vadd.f32 1.0, %v1928_v53  ;;  %680 = vmatpush.bf16.msrb.mxu3 %v1851_v52  ;;  %v1850_v53 = vld [vmem:[#allocation10 + $0x20] sm:$0xff] }
 0x2db   :  { %1929 = vrcp.f32 %v466_v54  ;;  %v478_v58 = vand.u32 2147483648, %v466_v54  ;;  %v476_v62 = vand.u32 2147483647, %v466_v54  ;;  %vm472_vm14 = vweird.f32 %v466_v54 }
 0x2dd   :  { %v479_v0 = vor.u32 1.1754944e-38, %v478_v58  ;;  %vm477_vm0 = vcmp.eq.f32.partialorder %v476_v62, 8.507059e+37  ;;  %681 = vmatpush.bf16.msrb.mxu3 %v1850_v53  ;;  %v1847_v58 = vld [vmem:[#allocation10 + $0x8] sm:$0xff] }
 0x2e1   :  { %v1930_v55 = vpop.eup %1929 }
 0x2e2   :  { %v468_v56 = vmul.f32 %v1930_v55, %v466_v54  ;;  %vm473_vm13 = vweird.f32 %v1930_v55  ;;  %v1849_v54 = vld [vmem:[#allocation10 + $0x18] sm:$0xff] }
 0x2e3   :  { %vm474_vm15 = vmor %vm472_vm14, %vm473_vm13  ;;  %682 = vmatpush.bf16.msrb.mxu3 %v1849_v54 }
 0x2e4   :  { %v469_v57 = vsub.f32 1.0, %v468_v56 }
 0x2e6   :  { %v470_v59 = vmul.f32 %v1930_v55, %v469_v57  ;;  %v1848_v57 = vld [vmem:[#allocation10 + $0x10] sm:$0xff] }
 0x2e7   :  { %683 = vmatpush.bf16.msrb.mxu3 %v1848_v57 }
 0x2e8   :  { %v471_v63 = vadd.f32 %v1930_v55, %v470_v59  ;;  %v1846_v59 = vld [vmem:[#allocation10] sm:$0xff] }
 0x2ea   :  { %v475_v1 = vsel %vm474_vm15, %v1930_v55, %v471_v63 }
 0x2eb   :  { %v480_v3 = vsel %vm477_vm0, %v479_v0, %v475_v1  ;;  %684 = vmatpush.bf16.msrb.mxu3 %v1847_v58 }
 0x2ec   :  { %v482_v4 = vmul.f32 %v480_v3, %v2264_v2 }
 0x2ee   :  { %v483_v5 = vadd.f32 %v482_v4, %v2275_v22 }
 0x2ef   :  { %685 = vmatpush.bf16.msrb.mxu3 %v1846_v59 }
 0x2f0   :  { %484 = vrot.lane.b32.xlu1 %v483_v5, %s2113_s25  ;;  %v487_v18 = vmul.f32 %v483_v5, %v377_v43 }
 0x362   :  { %v485_v13 = vpop.permute.xlu1 %484 }
 0x363   :  { %v486_v14 = vmul.f32 %v485_v13, %v483_v5 }
 0x365   :  { %488 = vrot.lane.b32.xlu1 %v486_v14, %s2123_s8 }
 0x3d7   :  { %v489_v20 = vpop.permute.xlu1 %488 }
 0x3d8   :  { %v490_v21 = vadd.f32 %v489_v20, %v487_v18 }
 0x3da   :  { %v491_v23 = vsel %vm2288_vm12, %v490_v21, 0.0 }
 0x3db   :  { %1931 = vtanh.f32 %v491_v23 }
 0x3e1   :  { %v1932_v24 = vpop.eup %1931 }
 0x3e2   :  { %v2306_v25 = vmul.f32 %v1932_v24, %v485_v13 }
 0x3e4   :  { %v498_v27 = vpack.c.bf16 %v2306_v25, %v2306_v25  ;;  %v1194_v58 = vpack.c.bf16 %v2306_v25, %v2294_v45  ;;  %v2348_v45 = vld [vmem:[%s2526_s9] ss:$0 sm:$0xff] }
 0x3e6   :  { %571 = vmatmul.bf16.vlgmr.msra.gmra.mxu2 %v498_v27 }
 0x469   :  { %v572_v30 = vpop.f32.mrf.mxu2 }
 0x46a   :  { %v576_v31 = vadd.f32 %v572_v30, %v237_v29 }
 0x46c   :  { %v577_v32 = vmul.f32 %v576_v31, %v2264_v2 }
 0x46e   :  { %v1621_v33 = vmul.f32 -1.442695, %v577_v32  ;;  %v1861_v32 = vld [vmem:[#allocation10 + $0x38] sm:$0xff] }
 0x46f   :  { %793 = vmatpush.bf16.msra.mxu0 %v1861_v32 }
 0x470   :  { %1933 = vpow2.f32 %v1621_v33  ;;  %v1860_v33 = vld [vmem:[#allocation10 + $0x30] sm:$0xff] }
 0x471   :  { %v574_v34 = vpop.f32.mrf.mxu2 }
 0x472   :  { %v1859_v34 = vld [vmem:[#allocation10 + $0x28] sm:$0xff] }
 0x473   :  { %794 = vmatpush.bf16.msra.mxu0 %v1860_v33  ;;  %v1297_v33 = vld [vmem:[#allocation4 + $0x10] sm:$0xff] }
 0x476   :  { %v1934_v35 = vpop.eup %1933 }
 0x477   :  { %v581_v36 = vadd.f32 1.0, %v1934_v35  ;;  %795 = vmatpush.bf16.msra.mxu0 %v1859_v34  ;;  %v1858_v35 = vld [vmem:[#allocation10 + $0x20] sm:$0xff] }
 0x479   :  { %1935 = vrcp.f32 %v581_v36  ;;  %v593_v41 = vand.u32 2147483648, %v581_v36  ;;  %v591_v43 = vand.u32 2147483647, %v581_v36  ;;  %vm587_vm2 = vweird.f32 %v581_v36 }
 0x47b   :  { %v594_v9 = vor.u32 1.1754944e-38, %v593_v41  ;;  %vm592_vm4 = vcmp.eq.f32.partialorder %v591_v43, 8.507059e+37  ;;  %796 = vmatpush.bf16.msra.mxu0 %v1858_v35  ;;  %v1893_v41 = vld [vmem:[#allocation11 + $0x38] sm:$0xff] }
 0x47f   :  { %v1936_v37 = vpop.eup %1935 }
 0x480   :  { %v583_v38 = vmul.f32 %v1936_v37, %v581_v36  ;;  %vm588_vm1 = vweird.f32 %v1936_v37  ;;  %v1857_v36 = vld [vmem:[#allocation10 + $0x18] sm:$0xff] }
 0x481   :  { %vm589_vm3 = vmor %vm587_vm2, %vm588_vm1  ;;  %797 = vmatpush.bf16.msra.mxu0 %v1857_v36  ;;  %v1305_v36 = vld [vmem:[%s2518_s1 + $0x10] sm:$0xff] }
 0x482   :  { %v584_v39 = vsub.f32 1.0, %v583_v38  ;;  %v1855_v38 = vld [vmem:[#allocation10 + $0x8] sm:$0xff] }
 0x484   :  { %v585_v42 = vmul.f32 %v1936_v37, %v584_v39  ;;  %v1854_v39 = vld [vmem:[#allocation10] sm:$0xff] }
 0x486   :  { %v586_v44 = vadd.f32 %v1936_v37, %v585_v42 }
 0x488   :  { %v590_v46 = vsel %vm589_vm3, %v1936_v37, %v586_v44  ;;  %v1856_v37 = vld [vmem:[#allocation10 + $0x10] sm:$0xff] }
 0x489   :  { %v595_v47 = vsel %vm592_vm4, %v594_v9, %v590_v46  ;;  %798 = vmatpush.bf16.msra.mxu0 %v1856_v37  ;;  %v1892_v44 = vld [vmem:[#allocation11 + $0x30] sm:$0xff]  ;;  %v1891_v9 = vld [vmem:[#allocation11 + $0x28] sm:$0xff]  ;;  %v1890_v46 = vld [vmem:[#allocation11 + $0x20] sm:$0xff] }
 0x48a   :  { %v597_v48 = vmul.f32 %v595_v47, %v2264_v2  ;;  %v1889_v47 = vld [vmem:[#allocation11 + $0x18] sm:$0xff] }
 0x48c   :  { %v598_v49 = vadd.f32 %v597_v48, %v2275_v22  ;;  %v1888_v48 = vld [vmem:[#allocation11 + $0x10] sm:$0xff] }
 0x48d   :  { %799 = vmatpush.bf16.msra.mxu0 %v1855_v38  ;;  %v1375_v38 = vand.u32 3, %v2248_v60 }
 0x48e   :  { %599 = vrot.lane.b32.xlu2 %v598_v49, %s2113_s25  ;;  %v602_v62 = vmul.f32 %v598_v49, %v491_v23 }
 0x48f   :  { %vm2374_vm14 = vcmp.lt.s32.totalorder %v1375_v38, 2 }
 0x491   :  { %800 = vmatpush.bf16.msra.mxu0 %v1854_v39 }
 0x495   :  { %1266 = vmatpush.bf16.msrb.mxu0 %v1893_v41 }
 0x499   :  { %1267 = vmatpush.bf16.msrb.mxu0 %v1892_v44 }
 0x49d   :  { %1268 = vmatpush.bf16.msrb.mxu0 %v1891_v9  ;;  %v1321_v9 = vmul.f32 %v1305_v36, %v1297_v33 }
 0x4a1   :  { %1269 = vmatpush.bf16.msrb.mxu0 %v1890_v46 }
 0x4a5   :  { %1270 = vmatpush.bf16.msrb.mxu0 %v1889_v47 }
 0x4a9   :  { %1271 = vmatpush.bf16.msrb.mxu0 %v1888_v48 }
 0x4e8   :  { %v600_v55 = vpop.permute.xlu2 %599 }
 0x4e9   :  { %v601_v56 = vmul.f32 %v600_v55, %v598_v49  ;;  %v1887_v49 = vld [vmem:[#allocation11 + $0x8] sm:$0xff] }
 0x4ea   :  { %1272 = vmatpush.bf16.msrb.mxu0 %v1887_v49 }
 0x4eb   :  { %603 = vrot.lane.b32.xlu2 %v601_v56, %s2123_s8 }
 0x4ee   :  { %1273 = vmatpush.bf16.msrb.mxu0 %v1886_v50 }
 0x545   :  { %v604_v63 = vpop.permute.xlu2 %603 }
 0x546   :  { %v605_v0 = vadd.f32 %v604_v63, %v602_v62  ;;  %v242_v62 = vadd.f32 %v2255_v61, %v2271_v19 }
 0x548   :  { %v2319_v1 = vsel %vm2288_vm12, %v605_v0, 0.0 }
 0x549   :  { %1937 = vtanh.f32 %v2319_v1 }
 0x54f   :  { %v1938_v3 = vpop.eup %1937 }
 0x550   :  { %v2322_v4 = vmul.f32 %v1938_v3, %v600_v55 }
 0x552   :  { %v613_v5 = vpack.c.bf16 %v2322_v4, %v2322_v4 }
 0x554   :  { %686 = vmatmul.bf16.vlgmr.msrb.gmra.mxu3 %v613_v5 }
 0x5d7   :  { %v687_v7 = vpop.f32.mrf.mxu3 }
 0x5d8   :  { %v691_v8 = vadd.f32 %v687_v7, %v239_v6  ;;  %v1295_v6 = vld [vmem:[#allocation4] sm:$0xff] }
 0x5d9   :  { %v2353_v19 = vsub.f32 1.0, %v1295_v6 }
 0x5da   :  { %v692_v10 = vmul.f32 %v691_v8, %v2264_v2 }
 0x5dc   :  { %v1654_v12 = vmul.f32 -1.442695, %v692_v10 }
 0x5de   :  { %1939 = vpow2.f32 %v1654_v12 }
 0x5df   :  { %v689_v13 = vpop.f32.mrf.mxu3 }
 0x5e4   :  { %v1940_v14 = vpop.eup %1939 }
 0x5e5   :  { %v696_v15 = vadd.f32 1.0, %v1940_v14  ;;  %v1296_v14 = vld [vmem:[#allocation4 + $0x8] sm:$0xff] }
 0x5e7   :  { %1941 = vrcp.f32 %v696_v15  ;;  %v708_v20 = vand.u32 2147483648, %v696_v15  ;;  %v706_v23 = vand.u32 2147483647, %v696_v15  ;;  %vm702_vm6 = vweird.f32 %v696_v15 }
 0x5e9   :  { %v709_v11 = vor.u32 1.1754944e-38, %v708_v20  ;;  %vm707_vm8 = vcmp.eq.f32.partialorder %v706_v23, 8.507059e+37 }
 0x5ed   :  { %v1942_v16 = vpop.eup %1941 }
 0x5ee   :  { %v698_v17 = vmul.f32 %v1942_v16, %v696_v15  ;;  %vm703_vm5 = vweird.f32 %v1942_v16 }
 0x5ef   :  { %vm704_vm7 = vmor %vm702_vm6, %vm703_vm5 }
 0x5f0   :  { %v699_v18 = vsub.f32 1.0, %v698_v17  ;;  %v1304_v17 = vld [vmem:[%s2518_s1 + $0x8] sm:$0xff] }
 0x5f2   :  { %v700_v21 = vmul.f32 %v1942_v16, %v699_v18 }
 0x5f4   :  { %v701_v24 = vadd.f32 %v1942_v16, %v700_v21  ;;  %v2360_v21 = vsub.f32 1.0, %v1296_v14 }
 0x5f6   :  { %v705_v27 = vsel %vm704_vm7, %v1942_v16, %v701_v24 }
 0x5f7   :  { %v710_v29 = vsel %vm707_vm8, %v709_v11, %v705_v27  ;;  %v1320_v11 = vmul.f32 %v1304_v17, %v1296_v14 }
 0x5f8   :  { %v712_v30 = vmul.f32 %v710_v29, %v2264_v2 }
 0x5fa   :  { %v713_v31 = vadd.f32 %v712_v30, %v2275_v22 }
 0x5fc   :  { %714 = vrot.lane.b32.xlu0 %v713_v31, %s2113_s25  ;;  %v717_v51 = vmul.f32 %v713_v31, %v2319_v1 }
 0x66e   :  { %v715_v42 = vpop.permute.xlu0 %714 }
 0x66f   :  { %v716_v43 = vmul.f32 %v715_v42, %v713_v31 }
 0x671   :  { %718 = vrot.lane.b32.xlu1 %v716_v43, %s2123_s8 }
 0x6e3   :  { %v719_v52 = vpop.permute.xlu1 %718 }
 0x6e4   :  { %v720_v53 = vadd.f32 %v719_v52, %v717_v51 }
 0x6e6   :  { %v2336_v54 = vsel %vm2288_vm12, %v720_v53, 0.0 }
 0x6e7   :  { %1943 = vtanh.f32 %v2336_v54 }
 0x6ed   :  { %v1944_v55 = vpop.eup %1943 }
 0x6ee   :  { %v723_v56 = vmul.f32 %v1944_v55, %v715_v42  ;;  %v2369_v42 = vsub.f32 1.0, %v1297_v33  ;;  %v1298_v55 = vld [vmem:[#allocation4 + $0x18] sm:$0xff] }
 0x6f0   :  { %v728_v57 = vpack.c.bf16 %v723_v56, %v723_v56  ;;  %v1195_v59 = vpack.c.bf16 %v723_v56, %v2322_v4  ;;  %v1303_v4 = vld [vmem:[%s2518_s1] sm:$0xff] }
 0x6f1   :  { %v1319_v12 = vmul.f32 %v1303_v4, %v1295_v6 }
 0x6f2   :  { %801 = vmatmul.bf16.vlgmr.msra.gmra.mxu0 %v728_v57 }
 0x702   :  { %1274 = vmatmul.bf16.vlgmr.msrb.gmra.mxu0 %v1194_v58 }
 0x712   :  { %1279 = vmatmul.bf16.gmra.mxu0 %v1195_v59 }
 0x76f   :  { %v802_v63 = vpop.f32.mrf.mxu0 }
 0x770   :  { %v806_v0 = vadd.f32 %v802_v63, %v242_v62  ;;  %v1306_v63 = vld [vmem:[%s2518_s1 + $0x18] sm:$0xff] }
 0x772   :  { %v807_v1 = vmul.f32 %v806_v0, %v2264_v2 }
 0x774   :  { %v1687_v3 = vmul.f32 -1.442695, %v807_v1  ;;  %v2388_v1 = vsub.f32 1.0, %v1298_v55 }
 0x776   :  { %1945 = vpow2.f32 %v1687_v3 }
 0x777   :  { %v804_v5 = vpop.f32.mrf.mxu0 }
 0x77c   :  { %v1946_v7 = vpop.eup %1945 }
 0x77d   :  { %v811_v25 = vadd.f32 1.0, %v1946_v7  ;;  %v1322_v7 = vmul.f32 %v1306_v63, %v1298_v55 }
 0x77f   :  { %1947 = vrcp.f32 %v811_v25  ;;  %v1275_v8 = vpop.f32.mrf.mxu0  ;;  %v823_v29 = vand.u32 2147483648, %v811_v25  ;;  %v821_v32 = vand.u32 2147483647, %v811_v25  ;;  %vm817_vm10 = vweird.f32 %v811_v25 }
 0x780   :  { %v1276_v10 = vadd.f32 %v2348_v45, %v1275_v8 }
 0x781   :  { %v824_v39 = vor.u32 1.1754944e-38, %v823_v29  ;;  %vm822_vm13 = vcmp.eq.f32.partialorder %v821_v32, 8.507059e+37  ;;  %v1865_v29 = vld [vmem:[#allocation10 + $0x18] sm:$0xff] }
 0x782   :  { %v1327_v13 = vmul.f32 %v2353_v19, %v1276_v10 }
 0x784   :  { %v1335_v15 = vadd.f32 %v1327_v13, %v1319_v12 }
 0x785   :  { %v1948_v16 = vpop.eup %1947 }
 0x786   :  { %v813_v18 = vmul.f32 %v1948_v16, %v811_v25  ;;  %1343 = vst [vmem:[#allocation13] sm:$0xff] %v1335_v15  ;;  %v1351_v20 = vsub.f32 %v1335_v15, %v1303_v4  ;;  %vm818_vm9 = vweird.f32 %v1948_v16 }
 0x787   :  { %v1277_v23 = vpop.f32.mrf.mxu0  ;;  %vm819_vm11 = vmor %vm817_vm10, %vm818_vm9 }
 0x788   :  { %v1278_v24 = vadd.f32 %v2348_v45, %v1277_v23  ;;  %v814_v27 = vsub.f32 1.0, %v813_v18  ;;  %v1359_v34 = vmul.f32 %v1351_v20, %v2353_v19  ;;  %v1869_v23 = vld [vmem:[#allocation10 + $0x38] sm:$0xff] }
 0x789   :  { %908 = vmatpush.bf16.msra.mxu1 %v1869_v23 }
 0x78a   :  { %v1328_v30 = vmul.f32 %v2360_v21, %v1278_v24  ;;  %v815_v31 = vmul.f32 %v1948_v16, %v814_v27  ;;  %v1367_v47 = vand.u32 2147483647, %v1359_v34  ;;  %v1868_v24 = vld [vmem:[#allocation10 + $0x30] sm:$0xff]  ;;  %v1866_v27 = vld [vmem:[#allocation10 + $0x20] sm:$0xff] }
 0x78b   :  { %v1862_v34 = vld [vmem:[#allocation10] sm:$0xff] }
 0x78c   :  { %v1336_v35 = vadd.f32 %v1328_v30, %v1320_v11  ;;  %v816_v37 = vadd.f32 %v1948_v16, %v815_v31  ;;  %v1377_v56 = vsel %vm2374_vm14, %v1367_v47, 0.0  ;;  %v1867_v11 = vld [vmem:[#allocation10 + $0x28] sm:$0xff]  ;;  %v1864_v30 = vld [vmem:[#allocation10 + $0x10] sm:$0xff] }
 0x78d   :  { %909 = vmatpush.bf16.msra.mxu1 %v1868_v24  ;;  %v1863_v31 = vld [vmem:[#allocation10 + $0x8] sm:$0xff] }
 0x78e   :  { %1344 = vst [vmem:[#allocation13 + $0x8] sm:$0xff] %v1336_v35  ;;  %v1352_v41 = vsub.f32 %v1336_v35, %v1304_v17  ;;  %v820_v43 = vsel %vm819_vm11, %v1948_v16, %v816_v37 }
 0x78f   :  { %v1280_v44 = vpop.f32.mrf.mxu0  ;;  %v825_v46 = vsel %vm822_vm13, %v824_v39, %v820_v43 }
 0x790   :  { %v1360_v48 = vmul.f32 %v1352_v41, %v2360_v21  ;;  %v1281_v49 = vadd.f32 %v2348_v45, %v1280_v44  ;;  %v827_v50 = vmul.f32 %v825_v46, %v2264_v2  ;;  %v2406_v44 = vpop.f32.mrf.mxu1 }
 0x791   :  { %910 = vmatpush.bf16.msra.mxu1 %v1867_v11 }
 0x792   :  { %v1368_v51 = vand.u32 2147483647, %v1360_v48  ;;  %v1329_v52 = vmul.f32 %v2369_v42, %v1281_v49  ;;  %v828_v53 = vadd.f32 %v827_v50, %v2275_v22 }
 0x794   :  { %v1378_v57 = vsel %vm2374_vm14, %v1368_v51, 0.0  ;;  %v1425_v58 = vadd.f32 %v1368_v51, %v1367_v47  ;;  %v1337_v59 = vadd.f32 %v1329_v52, %v1321_v9  ;;  %829 = vrot.lane.b32.xlu2 %v828_v53, %s2113_s25  ;;  %v832_v35 = vmul.f32 %v828_v53, %v2336_v54 }
 0x795   :  { %v1385_v62 = vadd.f32 %v1378_v57, %v1377_v56  ;;  %911 = vmatpush.bf16.msra.mxu1 %v1866_v27  ;;  %v244_v9 = vadd.f32 %v2255_v61, %v2280_v26 }
 0x796   :  { %1345 = vst [vmem:[#allocation13 + $0x10] sm:$0xff] %v1337_v59  ;;  %v1353_v0 = vsub.f32 %v1337_v59, %v1305_v36 }
 0x797   :  { %v1282_v3 = vpop.f32.mrf.mxu0 }
 0x798   :  { %v1361_v5 = vmul.f32 %v1353_v0, %v2369_v42  ;;  %v1283_v6 = vadd.f32 %v2348_v45, %v1282_v3  ;;  %v1877_v3 = vld [vmem:[#allocation10 + $0x38] sm:$0xff] }
 0x799   :  { %912 = vmatpush.bf16.msra.mxu1 %v1865_v29  ;;  %1023 = vmatpush.bf16.msrb.mxu2 %v1877_v3  ;;  %v1299_v29 = vld [vmem:[#allocation4 + $0x20] sm:$0xff] }
 0x79a   :  { %v1369_v25 = vand.u32 2147483647, %v1361_v5  ;;  %v1330_v4 = vmul.f32 %v2388_v1, %v1283_v6  ;;  %v1876_v5 = vld [vmem:[#allocation10 + $0x30] sm:$0xff]  ;;  %v1875_v6 = vld [vmem:[#allocation10 + $0x28] sm:$0xff] }
 0x79c   :  { %v1379_v8 = vsel %vm2374_vm14, %v1369_v25, 0.0  ;;  %v1426_v10 = vadd.f32 %v1425_v58, %v1369_v25  ;;  %v1338_v12 = vadd.f32 %v1330_v4, %v1322_v7  ;;  %v1874_v7 = vld [vmem:[#allocation10 + $0x20] sm:$0xff]  ;;  %v1873_v25 = vld [vmem:[#allocation10 + $0x18] sm:$0xff] }
 0x79d   :  { %v1386_v13 = vadd.f32 %v1385_v62, %v1379_v8  ;;  %913 = vmatpush.bf16.msra.mxu1 %v1864_v30  ;;  %1024 = vmatpush.bf16.msrb.mxu2 %v1876_v5  ;;  %v1307_v30 = vld [vmem:[%s2518_s1 + $0x20] sm:$0xff] }
 0x79e   :  { %1346 = vst [vmem:[#allocation13 + $0x18] sm:$0xff] %v1338_v12  ;;  %v1354_v14 = vsub.f32 %v1338_v12, %v1306_v63  ;;  %v1871_v12 = vld [vmem:[#allocation10 + $0x8] sm:$0xff] }
 0x7a0   :  { %v1362_v15 = vmul.f32 %v1354_v14, %v2388_v1 }
 0x7a1   :  { %914 = vmatpush.bf16.msra.mxu1 %v1863_v31  ;;  %1025 = vmatpush.bf16.msrb.mxu2 %v1875_v6  ;;  %v2423_v31 = vsub.f32 1.0, %v1299_v29 }
 0x7a2   :  { %v1370_v16 = vand.u32 2147483647, %v1362_v15 }
 0x7a4   :  { %v2396_v17 = vadd.f32 %v1426_v10, %v1370_v16  ;;  %v1380_v18 = vsel %vm2374_vm14, %v1370_v16, 0.0  ;;  %v1872_v10 = vld [vmem:[#allocation10 + $0x10] sm:$0xff] }
 0x7a5   :  { %v2400_v20 = vadd.f32 %v1386_v13, %v1380_v18  ;;  %915 = vmatpush.bf16.msra.mxu1 %v1862_v34  ;;  %1026 = vmatpush.bf16.msrb.mxu2 %v1874_v7  ;;  %v1870_v13 = vld [vmem:[#allocation10] sm:$0xff]  ;;  %v1323_v34 = vmul.f32 %v1307_v30, %v1299_v29 }
 0x7a9   :  { %1027 = vmatpush.bf16.msrb.mxu2 %v1873_v25 }
 0x7ad   :  { %1028 = vmatpush.bf16.msrb.mxu2 %v1872_v10 }
 0x7b1   :  { %1029 = vmatpush.bf16.msrb.mxu2 %v1871_v12 }
 0x7b5   :  { %1030 = vmatpush.bf16.msrb.mxu2 %v1870_v13 }
 0x7ee   :  { %v830_v32 = vpop.permute.xlu2 %829 }
 0x7ef   :  { %v831_v33 = vmul.f32 %v830_v32, %v828_v53 }
 0x7f1   :  { %833 = vrot.lane.b32.xlu0 %v831_v33, %s2123_s8 }
 0x863   :  { %v834_v36 = vpop.permute.xlu0 %833 }
 0x864   :  { %v835_v37 = vadd.f32 %v834_v36, %v832_v35  ;;  %v1300_v36 = vld [vmem:[#allocation4 + $0x28] sm:$0xff] }
 0x866   :  { %v836_v38 = vsel %vm2288_vm12, %v835_v37, 0.0 }
 0x867   :  { %1949 = vtanh.f32 %v836_v38 }
 0x86d   :  { %v1950_v39 = vpop.eup %1949 }
 0x86e   :  { %v838_v41 = vmul.f32 %v1950_v39, %v830_v32  ;;  %v1308_v39 = vld [vmem:[%s2518_s1 + $0x28] sm:$0xff] }
 0x870   :  { %v843_v43 = vpack.c.bf16 %v838_v41, %v838_v41 }
 0x872   :  { %916 = vmatmul.bf16.vlgmr.msra.gmra.mxu1 %v843_v43 }
 0x8ef   :  { %v917_v46 = vpop.f32.mrf.mxu1 }
 0x8f0   :  { %v921_v47 = vadd.f32 %v917_v46, %v244_v9  ;;  %v2431_v9 = vsub.f32 1.0, %v1300_v36 }
 0x8f2   :  { %v922_v48 = vmul.f32 %v921_v47, %v2264_v2 }
 0x8f4   :  { %v1720_v54 = vmul.f32 -1.442695, %v922_v48 }
 0x8f6   :  { %1951 = vpow2.f32 %v1720_v54 }
 0x8f7   :  { %v919_v49 = vpop.f32.mrf.mxu1 }
 0x8f8   :  { %v1324_v49 = vmul.f32 %v1308_v39, %v1300_v36 }
 0x8fc   :  { %v1952_v50 = vpop.eup %1951 }
 0x8fd   :  { %v926_v51 = vadd.f32 1.0, %v1952_v50 }
 0x8ff   :  { %1953 = vrcp.f32 %v926_v51  ;;  %v938_v56 = vand.u32 2147483648, %v926_v51  ;;  %v936_v58 = vand.u32 2147483647, %v926_v51  ;;  %vm932_vm0 = vweird.f32 %v926_v51 }
 0x901   :  { %v939_v61 = vor.u32 1.1754944e-38, %v938_v56  ;;  %vm937_vm2 = vcmp.eq.f32.partialorder %v936_v58, 8.507059e+37 }
 0x905   :  { %v1954_v52 = vpop.eup %1953 }
 0x906   :  { %v928_v53 = vmul.f32 %v1954_v52, %v926_v51  ;;  %vm933_vm15 = vweird.f32 %v1954_v52 }
 0x907   :  { %vm934_vm1 = vmor %vm932_vm0, %vm933_vm15 }
 0x908   :  { %v929_v55 = vsub.f32 1.0, %v928_v53 }
 0x90a   :  { %v930_v57 = vmul.f32 %v1954_v52, %v929_v55 }
 0x90c   :  { %v931_v59 = vadd.f32 %v1954_v52, %v930_v57 }
 0x90e   :  { %v935_v26 = vsel %vm934_vm1, %v1954_v52, %v931_v59 }
 0x90f   :  { %v940_v62 = vsel %vm937_vm2, %v939_v61, %v935_v26 }
 0x910   :  { %v942_v63 = vmul.f32 %v940_v62, %v2264_v2 }
 0x912   :  { %v943_v0 = vadd.f32 %v942_v63, %v2275_v22 }
 0x914   :  { %944 = vrot.lane.b32.xlu1 %v943_v0, %s2113_s25  ;;  %v947_v14 = vmul.f32 %v943_v0, %v836_v38 }
 0x986   :  { %v945_v4 = vpop.permute.xlu1 %944 }
 0x987   :  { %v946_v8 = vmul.f32 %v945_v4, %v943_v0 }
 0x989   :  { %948 = vrot.lane.b32.xlu2 %v946_v8, %s2123_s8 }
 0x9e3   :  { %v949_v15 = vpop.permute.xlu2 %948 }
 0x9e4   :  { %v950_v16 = vadd.f32 %v949_v15, %v947_v14  ;;  %v1885_v15 = vld [vmem:[#allocation10 + $0x38] sm:$0xff] }
 0x9e5   :  { %1138 = vmatpush.bf16.msra.mxu3 %v1885_v15 }
 0x9e6   :  { %v2417_v18 = vsel %vm2288_vm12, %v950_v16, 0.0  ;;  %v1884_v16 = vld [vmem:[#allocation10 + $0x30] sm:$0xff] }
 0x9e7   :  { %1955 = vtanh.f32 %v2417_v18 }
 0x9e9   :  { %1139 = vmatpush.bf16.msra.mxu3 %v1884_v16  ;;  %v1405_v16 = vsel %vm2374_vm14, %v2423_v31, 0.0 }
 0x9ed   :  { %v1956_v23 = vpop.eup %1955 }
 0x9ee   :  { %v953_v24 = vmul.f32 %v1956_v23, %v945_v4  ;;  %v1883_v23 = vld [vmem:[#allocation10 + $0x28] sm:$0xff] }
 0x9ef   :  { %1140 = vmatpush.bf16.msra.mxu3 %v1883_v23 }
 0x9f0   :  { %v958_v11 = vpack.c.bf16 %v953_v24, %v953_v24  ;;  %v1196_v27 = vpack.c.bf16 %v953_v24, %v838_v41  ;;  %v1882_v24 = vld [vmem:[#allocation10 + $0x20] sm:$0xff] }
 0x9f2   :  { %1031 = vmatmul.bf16.vlgmr.msrb.gmra.mxu2 %v958_v11  ;;  %1284 = vmatmul.bf16.gmra.mxu0 %v1196_v27  ;;  %v1881_v11 = vld [vmem:[#allocation10 + $0x18] sm:$0xff] }
 0x9f3   :  { %1141 = vmatpush.bf16.msra.mxu3 %v1882_v24 }
 0x9f7   :  { %1142 = vmatpush.bf16.msra.mxu3 %v1881_v11  ;;  %v1406_v11 = vsel %vm2374_vm14, %v2431_v9, 0.0 }
 0xa6f   :  { %v1285_v32 = vpop.f32.mrf.mxu0 }
 0xa70   :  { %v1286_v33 = vadd.f32 %v2348_v45, %v1285_v32  ;;  %v1879_v32 = vld [vmem:[#allocation10 + $0x8] sm:$0xff] }
 0xa72   :  { %v1331_v35 = vmul.f32 %v2423_v31, %v1286_v33  ;;  %v1878_v33 = vld [vmem:[#allocation10] sm:$0xff] }
 0xa74   :  { %v1339_v37 = vadd.f32 %v1331_v35, %v1323_v34 }
 0xa75   :  { %v1032_v38 = vpop.f32.mrf.mxu2 }
 0xa76   :  { %1347 = vst [vmem:[#allocation13 + $0x20] sm:$0xff] %v1339_v37  ;;  %v1355_v41 = vsub.f32 %v1339_v37, %v1307_v30  ;;  %v1036_v43 = vadd.f32 %v1032_v38, %v2283_v28  ;;  %v1880_v30 = vld [vmem:[#allocation10 + $0x10] sm:$0xff] }
 0xa77   :  { %v1287_v46 = vpop.f32.mrf.mxu0  ;;  %1143 = vmatpush.bf16.msra.mxu3 %v1880_v30  ;;  %v1441_v30 = vadd.f32 %v2360_v21, %v2353_v19 }
 0xa78   :  { %v1363_v47 = vmul.f32 %v1355_v41, %v2423_v31  ;;  %v1037_v48 = vmul.f32 %v1036_v43, %v2264_v2  ;;  %v1288_v54 = vadd.f32 %v2348_v45, %v1287_v46  ;;  %v1969_v43 = vld [vmem:[%s2523_s6] ss:$0 sm:$0xff] }
 0xa79   :  { %v249_v46 = vadd.f32 %v1969_v43, %v2406_v44 }
 0xa7a   :  { %v1371_v50 = vand.u32 2147483647, %v1363_v47  ;;  %v1753_v51 = vmul.f32 -1.442695, %v1037_v48  ;;  %v1332_v52 = vmul.f32 %v2431_v9, %v1288_v54 }
 0xa7b   :  { %1144 = vmatpush.bf16.msra.mxu3 %v1879_v32 }
 0xa7c   :  { %1957 = vpow2.f32 %v1753_v51  ;;  %v1340_v53 = vadd.f32 %v1332_v52, %v1324_v49  ;;  %v1428_v55 = vadd.f32 %v2396_v17, %v1371_v50  ;;  %v1381_v28 = vsel %vm2374_vm14, %v1371_v50, 0.0 }
 0xa7d   :  { %v1034_v56 = vpop.f32.mrf.mxu2  ;;  %v1388_v57 = vadd.f32 %v2400_v20, %v1381_v28 }
 0xa7e   :  { %1348 = vst [vmem:[#allocation13 + $0x28] sm:$0xff] %v1340_v53  ;;  %v1356_v58 = vsub.f32 %v1340_v53, %v1308_v39 }
 0xa7f   :  { %1145 = vmatpush.bf16.msra.mxu3 %v1878_v33 }
 0xa80   :  { %v1364_v59 = vmul.f32 %v1356_v58, %v2431_v9 }
 0xa82   :  { %v1958_v61 = vpop.eup %1957  ;;  %v1372_v26 = vand.u32 2147483647, %v1364_v59 }
 0xa83   :  { %v1041_v62 = vadd.f32 1.0, %v1958_v61 }
 0xa84   :  { %v2442_v63 = vadd.f32 %v1428_v55, %v1372_v26  ;;  %v1382_v0 = vsel %vm2374_vm14, %v1372_v26, 0.0 }
 0xa85   :  { %1959 = vrcp.f32 %v1041_v62  ;;  %v2446_v17 = vadd.f32 %v1388_v57, %v1382_v0  ;;  %v1053_v7 = vand.u32 2147483648, %v1041_v62  ;;  %v1051_v25 = vand.u32 2147483647, %v1041_v62 }
 0xa86   :  { %vm1047_vm4 = vweird.f32 %v1041_v62 }
 0xa87   :  { %v1054_v8 = vor.u32 1.1754944e-38, %v1053_v7  ;;  %vm1052_vm6 = vcmp.eq.f32.partialorder %v1051_v25, 8.507059e+37 }
 0xa8b   :  { %v1960_v3 = vpop.eup %1959 }
 0xa8c   :  { %v1043_v5 = vmul.f32 %v1960_v3, %v1041_v62  ;;  %vm1048_vm3 = vweird.f32 %v1960_v3 }
 0xa8d   :  { %vm1049_vm5 = vmor %vm1047_vm4, %vm1048_vm3 }
 0xa8e   :  { %v1044_v6 = vsub.f32 1.0, %v1043_v5 }
 0xa90   :  { %v1045_v20 = vmul.f32 %v1960_v3, %v1044_v6 }
 0xa92   :  { %v1046_v4 = vadd.f32 %v1960_v3, %v1045_v20 }
 0xa94   :  { %v1050_v10 = vsel %vm1049_vm5, %v1960_v3, %v1046_v4 }
 0xa95   :  { %v1055_v12 = vsel %vm1052_vm6, %v1054_v8, %v1050_v10 }
 0xa96   :  { %v1057_v13 = vmul.f32 %v1055_v12, %v2264_v2  ;;  %v1403_v12 = vsel %vm2374_vm14, %v2369_v42, 0.0 }
 0xa98   :  { %v1058_v14 = vadd.f32 %v1057_v13, %v2275_v22  ;;  %v1404_v13 = vsel %vm2374_vm14, %v2388_v1, 0.0 }
 0xa9a   :  { %1059 = vrot.lane.b32.xlu0 %v1058_v14, %s2113_s25  ;;  %v1062_v34 = vmul.f32 %v1058_v14, %v2417_v18 }
 0xb0c   :  { %v1060_v27 = vpop.permute.xlu0 %1059 }
 0xb0d   :  { %v1061_v29 = vmul.f32 %v1060_v27, %v1058_v14  ;;  %v1301_v14 = vld [vmem:[#allocation4 + $0x30] sm:$0xff] }
 0xb0e   :  { %v1317_v24 = vsub.f32 1.0, %v1301_v14 }
 0xb0f   :  { %1063 = vrot.lane.b32.xlu1 %v1061_v29, %s2123_s8 }
 0xb10   :  { %v1407_v33 = vsel %vm2374_vm14, %v1317_v24, 0.0 }
 0xb81   :  { %v1064_v35 = vpop.permute.xlu1 %1063 }
 0xb82   :  { %v1065_v36 = vadd.f32 %v1064_v35, %v1062_v34  ;;  %v1442_v35 = vadd.f32 %v1441_v30, %v2369_v42 }
 0xb84   :  { %v1066_v37 = vsel %vm2288_vm12, %v1065_v36, 0.0 }
 0xb85   :  { %1961 = vtanh.f32 %v1066_v37 }
 0xb8b   :  { %v1962_v38 = vpop.eup %1961 }
 0xb8c   :  { %v1068_v39 = vmul.f32 %v1962_v38, %v1060_v27  ;;  %v1302_v27 = vld [vmem:[#allocation4 + $0x38] sm:$0xff]  ;;  %v1443_v38 = vadd.f32 %v1442_v35, %v2388_v1 }
 0xb8d   :  { %v1318_v32 = vsub.f32 1.0, %v1302_v27  ;;  %v1310_v1 = vld [vmem:[%s2518_s1 + $0x38] sm:$0xff] }
 0xb8e   :  { %v1073_v41 = vpack.c.bf16 %v1068_v39, %v1068_v39 }
 0xb8f   :  { %v1408_v36 = vsel %vm2374_vm14, %v1318_v32, 0.0 }
 0xb90   :  { %1146 = vmatmul.bf16.vlgmr.msra.gmra.mxu3 %v1073_v41 }
 0xc13   :  { %v1147_v47 = vpop.f32.mrf.mxu3 }
 0xc14   :  { %v1151_v48 = vadd.f32 %v1147_v47, %v249_v46 }
 0xc16   :  { %v1152_v18 = vmul.f32 %v1151_v48, %v2264_v2 }
 0xc18   :  { %v1786_v54 = vmul.f32 -1.442695, %v1152_v18 }
 0xc1a   :  { %1963 = vpow2.f32 %v1786_v54 }
 0xc1b   :  { %v1149_v49 = vpop.f32.mrf.mxu3 }
 0xc1c   :  { %v1326_v49 = vmul.f32 %v1310_v1, %v1302_v27 }
 0xc20   :  { %v1964_v50 = vpop.eup %1963 }
 0xc21   :  { %v1156_v51 = vadd.f32 1.0, %v1964_v50 }
 0xc23   :  { %1965 = vrcp.f32 %v1156_v51  ;;  %v1168_v28 = vand.u32 2147483648, %v1156_v51  ;;  %v1166_v57 = vand.u32 2147483647, %v1156_v51  ;;  %vm1162_vm8 = vweird.f32 %v1156_v51 }
 0xc25   :  { %v1169_v44 = vor.u32 1.1754944e-38, %v1168_v28  ;;  %vm1167_vm10 = vcmp.eq.f32.partialorder %v1166_v57, 8.507059e+37 }
 0xc29   :  { %v1966_v52 = vpop.eup %1965 }
 0xc2a   :  { %v1158_v53 = vmul.f32 %v1966_v52, %v1156_v51  ;;  %vm1163_vm7 = vweird.f32 %v1966_v52 }
 0xc2b   :  { %vm1164_vm9 = vmor %vm1162_vm8, %vm1163_vm7 }
 0xc2c   :  { %v1159_v55 = vsub.f32 1.0, %v1158_v53 }
 0xc2e   :  { %v1160_v56 = vmul.f32 %v1966_v52, %v1159_v55 }
 0xc30   :  { %v1161_v58 = vadd.f32 %v1966_v52, %v1160_v56 }
 0xc32   :  { %v1165_v59 = vsel %vm1164_vm9, %v1966_v52, %v1161_v58 }
 0xc33   :  { %v1170_v61 = vsel %vm1167_vm10, %v1169_v44, %v1165_v59 }
 0xc34   :  { %v1172_v26 = vmul.f32 %v1170_v61, %v2264_v2  ;;  %v1401_v2 = vsel %vm2374_vm14, %v2353_v19, 0.0 }
 0xc36   :  { %v1173_v62 = vadd.f32 %v1172_v26, %v2275_v22  ;;  %v1402_v22 = vsel %vm2374_vm14, %v2360_v21, 0.0  ;;  %v1309_v21 = vld [vmem:[%s2518_s1 + $0x30] sm:$0xff]  ;;  %s2124_s1 = smov [#allocation13]  }
 0xc37   :  { %v1409_v10 = vadd.f32 %v1402_v22, %v1401_v2  ;;  %v1325_v47 = vmul.f32 %v1309_v21, %v1301_v14  ;;  %s1471_s18 = sshll.u32 %s2124_s1, 4  ;;  %s1472_s18 = int_to_ptr.vmem [resolvable:$true] %s1471_s18 }
 0xc38   :  { %1174 = vrot.lane.b32.xlu2 %v1173_v62, %s2113_s25  ;;  %v1177_v5 = vmul.f32 %v1173_v62, %v1066_v37 }
 0xc39   :  { %v1410_v40 = vadd.f32 %v1409_v10, %v1403_v12 }
 0xc3b   :  { %v1411_v15 = vadd.f32 %v1410_v40, %v1404_v13 }
 0xc3d   :  { %v1412_v23 = vadd.f32 %v1411_v15, %v1405_v16 }
 0xc3f   :  { %v1413_v29 = vadd.f32 %v1412_v23, %v1406_v11 }
 0xc41   :  { %v1414_v34 = vadd.f32 %v1413_v29, %v1407_v33 }
 0xc43   :  { %v1415_v37 = vadd.f32 %v1414_v34, %v1408_v36 }
 0xc61   :  { %1416 = vadd.xlane.f32.xlu2 %v1415_v37 }
 0xc92   :  { %v1175_v0 = vpop.permute.xlu2 %1174 }
 0xc93   :  { %v1176_v3 = vmul.f32 %v1175_v0, %v1173_v62 }
 0xc95   :  { %1178 = vrot.lane.b32.xlu0 %v1176_v3, %s2123_s8 }
 0xd07   :  { %v1179_v6 = vpop.permute.xlu0 %1178 }
 0xd08   :  { %v1180_v7 = vadd.f32 %v1179_v6, %v1177_v5 }
 0xd0a   :  { %v1181_v20 = vsel %vm2288_vm12, %v1180_v7, 0.0 }
 0xd0b   :  { %1967 = vtanh.f32 %v1181_v20 }
 0xd11   :  { %v1968_v25 = vpop.eup %1967 }
 0xd12   :  { %v1183_v4 = vmul.f32 %v1968_v25, %v1175_v0 }
 0xd14   :  { %v1197_v8 = vpack.c.bf16 %v1183_v4, %v1068_v39  ;;  %v1444_v39 = vadd.f32 %v1443_v38, %v2423_v31 }
 0xd16   :  { %1289 = vmatmul.bf16.gmra.mxu0 %v1197_v8  ;;  %v1445_v41 = vadd.f32 %v1444_v39, %v2431_v9 }
 0xd18   :  { %v1446_v43 = vadd.f32 %v1445_v41, %v1317_v24 }
 0xd1a   :  { %v1447_v19 = vadd.f32 %v1446_v43, %v1318_v32 }
 0xd1c   :  { %1448 = vadd.xlane.f32.xlu2 %v1447_v19 }
 0xd93   :  { %v1290_v46 = vpop.f32.mrf.mxu0 }
 0xd94   :  { %v1291_v42 = vadd.f32 %v2348_v45, %v1290_v46 }
 0xd96   :  { %v1333_v48 = vmul.f32 %v1317_v24, %v1291_v42 }
 0xd98   :  { %v1341_v18 = vadd.f32 %v1333_v48, %v1325_v47 }
 0xd9a   :  { %1349 = vst [vmem:[#allocation13 + $0x30] sm:$0xff] %v1341_v18  ;;  %v1357_v31 = vsub.f32 %v1341_v18, %v1309_v21 }
 0xd9b   :  { %v1292_v9 = vpop.f32.mrf.mxu0 }
 0xd9c   :  { %v1293_v54 = vadd.f32 %v2348_v45, %v1292_v9  ;;  %v1365_v50 = vmul.f32 %v1357_v31, %v1317_v24 }
 0xd9e   :  { %v1334_v51 = vmul.f32 %v1318_v32, %v1293_v54  ;;  %v1373_v53 = vand.u32 2147483647, %v1365_v50 }
 0xda0   :  { %v1342_v52 = vadd.f32 %v1334_v51, %v1326_v49  ;;  %v1383_v56 = vsel %vm2374_vm14, %v1373_v53, 0.0  ;;  %v1430_v58 = vadd.f32 %v2442_v63, %v1373_v53  ;;  %v1417_v63 = vpop.xlane.xlu2 %1416 }
 0xda1   :  { %v1390_v44 = vadd.f32 %v2446_v17, %v1383_v56  ;;  %v1418_v26 = vrot.slane %v1417_v63, 4 }
 0xda2   :  { %1350 = vst [vmem:[#allocation13 + $0x38] sm:$0xff] %v1342_v52  ;;  %v1358_v55 = vsub.f32 %v1342_v52, %v1310_v1 }
 0xda3   :  { %1479 = dma.vmem_to_hbm [thread:$0]  %s1472_s18, 1024, %s1474_s4, [#allocation6], %s2116_s29, %s2116_s29, %s2117_s3   ;;  %v1419_v62 = vadd.f32 %v1418_v26, %v1417_v63 }
 0xda4   :  { %v1366_v28 = vmul.f32 %v1358_v55, %v1318_v32  ;;  %s1485_s3 = sshll.u32 %s2528_s11, 4  ;;  %s1486_s3 = int_to_ptr.hbm [resolvable:$true] %s1485_s3 }
 0xda5   :  { %v1420_v5 = vrot.slane %v1419_v62, 2 }
 0xda6   :  { %v1374_v57 = vand.u32 2147483647, %v1366_v28 }
 0xda7   :  { %v1421_v22 = vadd.f32 %v1420_v5, %v1419_v62 }
 0xda8   :  { %v1431_v59 = vadd.f32 %v1430_v58, %v1374_v57  ;;  %v1384_v45 = vsel %vm2374_vm14, %v1374_v57, 0.0  ;;  %v1449_v17 = vpop.xlane.xlu2 %1448 }
 0xda9   :  { %v1391_v61 = vadd.f32 %v1390_v44, %v1384_v45  ;;  %v1450_v60 = vrot.slane %v1449_v17, 4  ;;  %v1422_v14 = vrot.slane %v1421_v22, 1 }
 0xdaa   :  { %1432 = vadd.xlane.f32.xlu0 %v1431_v59 }
 0xdab   :  { %1392 = vadd.xlane.f32.xlu1 %v1391_v61  ;;  %v1451_v0 = vadd.f32 %v1450_v60, %v1449_v17  ;;  %v1423_v27 = vadd.f32 %v1422_v14, %v1421_v22 }
 0xdad   :  { %v1452_v25 = vrot.slane %v1451_v0, 2 }
 0xdaf   :  { %v1453_v12 = vadd.f32 %v1452_v25, %v1451_v0 }
 0xdb1   :  { %v1454_v23 = vrot.slane %v1453_v12, 1 }
 0xdb3   :  { %v1455_v29 = vadd.f32 %v1454_v23, %v1453_v12 }
 0xe1d   :  { %v1433_v3 = vpop.xlane.xlu0 %1432 }
 0xe1e   :  { %v1434_v6 = vrot.slane %v1433_v3, 4  ;;  %v1393_v7 = vpop.xlane.xlu1 %1392 }
 0xe1f   :  { %v1394_v20 = vrot.slane %v1393_v7, 4 }
 0xe20   :  { %v1435_v4 = vadd.f32 %v1434_v6, %v1433_v3 }
 0xe21   :  { %v1395_v8 = vadd.f32 %v1394_v20, %v1393_v7 }
 0xe22   :  { %v1436_v2 = vrot.slane %v1435_v4, 2 }
 0xe23   :  { %v1396_v10 = vrot.slane %v1395_v8, 2 }
 0xe24   :  { %v1437_v40 = vadd.f32 %v1436_v2, %v1435_v4 }
 0xe25   :  { %v1397_v13 = vadd.f32 %v1396_v10, %v1395_v8 }
 0xe26   :  { %v1438_v15 = vrot.slane %v1437_v40, 1 }
 0xe27   :  { %v1398_v16 = vrot.slane %v1397_v13, 1 }
 0xe28   :  { %v1439_v11 = vadd.f32 %v1438_v15, %v1437_v40 }
 0xe29   :  { %v1399_v24 = vadd.f32 %v1398_v16, %v1397_v13 }
 0xe2b   :  { %1896 = vpush %v1399_v24 }
 0xe2c   :  { %1898 = vpush %v1423_v27 }
 0xe2d   :  { %1900 = vpush %v1439_v11 }
 0xe2e   :  { %1902 = vpush %v1455_v29 }
 0xe5c   :  { %s1897_s7 = spop %1896 }
 0xe5d   :  { %1458 = sst [smem:[#allocation14]] %s1897_s7  ;;  %s1899_s8 = spop %1898 }
 0xe5e   :  { %1460 = sst [smem:[#allocation14 + $0x1]] %s1899_s8  ;;  %s1901_s20 = spop %1900 }
 0xe5f   :  { %s1461_s21 = ssub.f32 %s1901_s20, %s1897_s7  ;;  %s1903_s22 = spop %1902 }
 0xe60   :  { %s1464_s23 = ssub.f32 %s1903_s22, %s1899_s8 }
 0xe61   :  { %1463 = sst [smem:[#allocation14 + $0x2]] %s1461_s21 }
 0xe62   :  { %1466 = sst [smem:[#allocation14 + $0x3]] %s1464_s23 }
 0xe63   :  { %1488 = dma.smem_to_hbm %s2125_s24, 16, %s1486_s3, [#allocation7]  }
 0xe64   :  { %2108 = dma.done.wait [#allocation6], 1024  }
 0xe65   :  { %2109 = vsyncadd [#allocation6], 4294966272 }
 0xe66   :  { %2110 = dma.done.wait [#allocation7], 16  }
 0xe67   :  { %2111 = vsyncadd [#allocation7], 4294967280 }
 0xe68   :  { %1497 = sfence }
 0xe69   :  { %1498 = vsyncpa [#allocation5], 1 }
 0xe6a   :  { %1499 = vsyncpa [#allocation9], 1 }
 0xe6b   :  { %1500 = vsyncpa [#allocation12], 1 }
 0xe6c   :  { %1501 = vsyncpa [#allocation6], 1 }
 0xe6d   :  { %1502 = vsyncpa [#allocation7], 1 }

</bundles_post_ra>
